<compile_context>
chip_gen: v7x
topology: tpu7x:2x2x1
jax: 0.10.0
libtpu: 0.0.40
codegen_flags: <defaults>
</compile_context>

<pallas_src>
import math

import jax
import jax.numpy as jnp
from jax.experimental import pallas as pl
from jax.experimental.pallas import tpu as pltpu

# ---- small synthetic hyper-parameters (module defaults are 512/8/2048/6) ----
VOCAB = 50           # len(token_mapping) stand-in
VOCAB_PAD = 128      # lane-dense padded vocab for the output projection
EMB_PAD = 128        # embedding rows padded to 128 (one-hot matmul K dim)
EMBED = 32           # embed_size
HEADS = 4            # num_heads
HEAD_DIM = EMBED // HEADS
HIDDEN = 64          # hidden_dim (FFN)
HIDDEN_PAD = 128     # lane-dense padded FFN hidden
LAYERS = 2           # num_layers
BATCH = 2
SEQ = 8
EPS = 1e-5           # LayerNorm eps (PyTorch default)
MAX_LEN = 64         # positional-encoding buffer length
VEC_ROWS = 8         # packed per-layer vector params (rows)
VEC_W = 128          # packed per-layer vector params (lane width)


def _layer_norm(x, w, b):
    mu = jnp.mean(x, axis=-1, keepdims=True)
    var = jnp.mean(jnp.square(x - mu), axis=-1, keepdims=True)
    return (x - mu) * jax.lax.rsqrt(var + EPS) * w + b


# ---------------------------------------------------------------------------
# Fused Pallas kernel: whole forward pass, one batch tile per grid step.
# ---------------------------------------------------------------------------
def fused_forward_kernel(src_ref, pe_ref, emb_ref, wqkv_ref, bqkv_ref,
                         wo_ref, w1_ref, w2_ref, vec_ref, wout_ref, bout_ref,
                         out_ref):
    m = src_ref.shape[0]                 # rows this grid step = batch_tile * S
    bt = m // SEQ

    # --- embedding as a one-hot MXU matmul (no scalar-driven gather chain);
    #     sqrt(E) is pre-folded into the bf16 embedding table. ---------------
    toks = src_ref[...]                                            # (m, 1) i32
    lane = jax.lax.broadcasted_iota(jnp.int32, (m, EMB_PAD), 1)
    onehot = jnp.where(lane == toks, 1.0, 0.0).astype(jnp.bfloat16)
    x = jnp.dot(onehot, emb_ref[...], preferred_element_type=jnp.float32)
    # Faithful to the reference module: with a batch_first input,
    # `x + self.pe[:x.size(0)]` indexes the PE buffer by *batch* position and
    # broadcasts it over the sequence; the wrapper pre-expands that slab.
    x = x + pe_ref[...]                                            # (m, E) f32

    # --- N x TransformerEncoderLayer (post-norm, relu), statically unrolled --
    for l in range(LAYERS):
        vec = vec_ref[l]                         # (8, 128) packed f32 vectors
        bo, ln1w, ln1b = vec[0, :EMBED], vec[1, :EMBED], vec[2, :EMBED]
        b1 = vec[3, :]                           # (HIDDEN_PAD,)
        b2, ln2w, ln2b = vec[4, :EMBED], vec[5, :EMBED], vec[6, :EMBED]

        # Self-attention: head-major weights -> q/k/v produced directly as
        # (3H, m, Dh) by one head-batched einsum; no sub-128-lane slices.
        xh = jnp.broadcast_to(x.astype(jnp.bfloat16)[None],
                              (3 * HEADS, m, EMBED))
        qkv = jnp.einsum('hme,hed->hmd', xh, wqkv_ref[l],
                         preferred_element_type=jnp.float32)       # (3H, m, Dh)
        qkv = qkv + bqkv_ref[l]                                    # (3H, 1, Dh)
        q, k, v = qkv[:HEADS], qkv[HEADS:2 * HEADS], qkv[2 * HEADS:]

        attn_rows = []
        for b in range(bt):                      # static; attention per sequence
            r0, r1 = b * SEQ, (b + 1) * SEQ
            qb, kb, vb = q[:, r0:r1], k[:, r0:r1], v[:, r0:r1]     # (H, S, Dh)
            s = jnp.einsum('hsd,htd->hst', qb, kb,
                           preferred_element_type=jnp.float32)     # (H, S, S)
            s = s - jnp.max(s, axis=-1, keepdims=True)
            p = jnp.exp(s)
            p = p * pl.reciprocal(jnp.sum(p, axis=-1, keepdims=True),
                                  approx=True)
            o = jnp.einsum('hst,htd->hsd', p, vb,
                           preferred_element_type=jnp.float32)     # (H, S, Dh)
            # Per-head output projection, reduced over the leading head axis
            # (replaces concat-heads + (S,E)@(E,E)).
            oh = jnp.einsum('hsd,hde->hse', o.astype(jnp.bfloat16), wo_ref[l],
                            preferred_element_type=jnp.float32)    # (H, S, E)
            attn_rows.append(jnp.sum(oh, axis=0) + bo)             # (S, E)
        attn = attn_rows[0] if bt == 1 else jnp.concatenate(attn_rows, axis=0)

        # Post-norm residual blocks (dropout = identity, inference).
        y = _layer_norm(x + attn, ln1w, ln1b)
        h1 = jnp.dot(y.astype(jnp.bfloat16), w1_ref[l],
                     preferred_element_type=jnp.float32) + b1      # (m, HID_PAD)
        h1 = jnp.maximum(h1, 0.0)
        h2 = jnp.dot(h1.astype(jnp.bfloat16), w2_ref[l],
                     preferred_element_type=jnp.float32) + b2
        x = _layer_norm(y + h2, ln2w, ln2b)

    # --- output projection, lane-dense (vocab padded to 128) ----------------
    logits = jnp.dot(x.astype(jnp.bfloat16), wout_ref[...],
                     preferred_element_type=jnp.float32) + bout_ref[...]
    out_ref[...] = logits.astype(out_ref.dtype)


# ---------------------------------------------------------------------------
# Wrapper: one pallas_call for the whole forward.
# ---------------------------------------------------------------------------
def transformer_forward(src, params, *, batch_tile=None):
    """batch_tile = batch rows per grid step.  Default splits the batch into
    (at most) two "parallel" grid steps (matches v7x's 2 TensorCores); pass
    batch_tile=B on single-TC chips (v5e/v6e) to collapse to one fatter step
    with the batch fully folded into the matmul M dimension."""
    B, S = src.shape
    if batch_tile is None:
        batch_tile = max(1, B // 2)
    assert B % batch_tile == 0 and S == SEQ
    steps = B // batch_tile
    m = batch_tile * S

    src_col = src.reshape(B * S, 1).astype(jnp.int32)
    # Pre-expand the module's per-batch PE slab to (B*S, E).
    pe_slab = jnp.broadcast_to(params["pe"][:B, 0, :][:, None, :],
                               (B, S, EMBED)).reshape(B * S, EMBED)

    out = pl.pallas_call(
        fused_forward_kernel,
        out_shape=jax.ShapeDtypeStruct((B * S, VOCAB_PAD), jnp.float32),
        grid_spec=pltpu.PrefetchScalarGridSpec(
            num_scalar_prefetch=0,
            grid=(steps,),
            in_specs=[
                pl.BlockSpec((m, 1), lambda g: (g, 0)),                  # tokens
                pl.BlockSpec((m, EMBED), lambda g: (g, 0)),              # PE slab
                pl.BlockSpec((EMB_PAD, EMBED), lambda g: (0, 0)),        # emb
                pl.BlockSpec((LAYERS, 3 * HEADS, EMBED, HEAD_DIM),
                             lambda g: (0, 0, 0, 0)),                    # Wqkv
                pl.BlockSpec((LAYERS, 3 * HEADS, 1, HEAD_DIM),
                             lambda g: (0, 0, 0, 0)),                    # bqkv
                pl.BlockSpec((LAYERS, HEADS, HEAD_DIM, EMBED),
                             lambda g: (0, 0, 0, 0)),                    # Wo
                pl.BlockSpec((LAYERS, EMBED, HIDDEN_PAD), lambda g: (0, 0, 0)),
                pl.BlockSpec((LAYERS, HIDDEN_PAD, EMBED), lambda g: (0, 0, 0)),
                pl.BlockSpec((LAYERS, VEC_ROWS, VEC_W), lambda g: (0, 0, 0)),
                pl.BlockSpec((EMBED, VOCAB_PAD), lambda g: (0, 0)),
                pl.BlockSpec((1, VOCAB_PAD), lambda g: (0, 0)),
            ],
            out_specs=pl.BlockSpec((m, VOCAB_PAD), lambda g: (g, 0)),
        ),
        compiler_params=pltpu.CompilerParams(
            dimension_semantics=("parallel",)),
    )(src_col, pe_slab, params["emb"], params["wqkv"], params["bqkv"],
      params["wo"], params["w1"], params["w2"], params["vecs"],
      params["w_out"], params["b_out"])

    return out.reshape(B, S, VOCAB_PAD)[:, :, :VOCAB]


# ---------------------------------------------------------------------------
# Parameters (deterministic synthetic init, packed for the kernel).
# ---------------------------------------------------------------------------
def init_params(key):
    scale = 0.02
    qscale = 1.0 / math.sqrt(HEAD_DIM)
    keys = jax.random.split(key, 3 + LAYERS)

    # Embedding table, pre-scaled by sqrt(E), vocab rows padded to 128.
    emb = jax.random.normal(keys[0], (VOCAB, EMBED), jnp.float32) * scale
    emb_pad = (jnp.zeros((EMB_PAD, EMBED), jnp.float32)
               .at[:VOCAB].set(emb * math.sqrt(EMBED))).astype(jnp.bfloat16)

    # PositionalEncoding buffer pe[max_len, 1, embed] (module layout).
    position = jnp.arange(MAX_LEN, dtype=jnp.float32)[:, None]
    div_term = jnp.exp(jnp.arange(0, EMBED, 2, dtype=jnp.float32)
                       * -(math.log(10000.0) / EMBED))
    pe = jnp.zeros((MAX_LEN, 1, EMBED), jnp.float32)
    pe = pe.at[:, 0, 0::2].set(jnp.sin(position * div_term))
    pe = pe.at[:, 0, 1::2].set(jnp.cos(position * div_term))

    def pad_lane(v):
        return jnp.pad(v, (0, VEC_W - v.shape[0]))

    def to_heads(w):            # torch (out=E, in=E) -> head-major (H, E, Dh)
        return jnp.transpose(w.reshape(HEADS, HEAD_DIM, EMBED), (0, 2, 1))

    wqkv_l, bqkv_l, wo_l, w1_l, w2_l, vec_l = [], [], [], [], [], []
    for l in range(LAYERS):
        lk = jax.random.split(keys[1 + l], 12)
        wq = jax.random.normal(lk[0], (EMBED, EMBED), jnp.float32) * scale
        wk = jax.random.normal(lk[1], (EMBED, EMBED), jnp.float32) * scale
        wv = jax.random.normal(lk[2], (EMBED, EMBED), jnp.float32) * scale
        wo = jax.random.normal(lk[3], (EMBED, EMBED), jnp.float32) * scale
        w1 = jax.random.normal(lk[4], (HIDDEN, EMBED), jnp.float32) * scale
        w2 = jax.random.normal(lk[5], (EMBED, HIDDEN), jnp.float32) * scale
        bq = jax.random.normal(lk[6], (EMBED,), jnp.float32) * scale
        bk = jax.random.normal(lk[7], (EMBED,), jnp.float32) * scale
        bv = jax.random.normal(lk[8], (EMBED,), jnp.float32) * scale
        b1 = jax.random.normal(lk[9], (HIDDEN,), jnp.float32) * scale
        b2 = jax.random.normal(lk[10], (EMBED,), jnp.float32) * scale

        # nn.Linear computes x @ W.T; store head-major (in, head_dim) blocks.
        # The 1/sqrt(head_dim) attention scale is folded into Wq / bq.
        wqkv_l.append(jnp.concatenate(
            [to_heads(wq) * qscale, to_heads(wk), to_heads(wv)], axis=0))
        bqkv_l.append(jnp.concatenate(
            [(bq * qscale).reshape(HEADS, 1, HEAD_DIM),
             bk.reshape(HEADS, 1, HEAD_DIM),
             bv.reshape(HEADS, 1, HEAD_DIM)], axis=0))
        wo_l.append(wo.T.reshape(HEADS, HEAD_DIM, EMBED))
        w1_l.append(jnp.zeros((EMBED, HIDDEN_PAD), jnp.float32)
                    .at[:, :HIDDEN].set(w1.T))
        w2_l.append(jnp.zeros((HIDDEN_PAD, EMBED), jnp.float32)
                    .at[:HIDDEN].set(w2.T))
        vec_l.append(jnp.stack([
            pad_lane(jnp.zeros((EMBED,), jnp.float32)),   # row 0: out-proj bias (MHA init 0)
            pad_lane(jnp.ones((EMBED,), jnp.float32)),    # row 1: ln1 weight
            pad_lane(jnp.zeros((EMBED,), jnp.float32)),   # row 2: ln1 bias
            pad_lane(b1),                                 # row 3: ffn bias 1 (padded)
            pad_lane(b2),                                 # row 4: ffn bias 2
            pad_lane(jnp.ones((EMBED,), jnp.float32)),    # row 5: ln2 weight
            pad_lane(jnp.zeros((EMBED,), jnp.float32)),   # row 6: ln2 bias
            jnp.zeros((VEC_W,), jnp.float32),             # row 7: unused
        ]))

    w_out = jax.random.normal(keys[-2], (VOCAB, EMBED), jnp.float32) * scale
    b_out = jax.random.normal(keys[-1], (VOCAB,), jnp.float32) * scale
    w_out_pad = (jnp.zeros((EMBED, VOCAB_PAD), jnp.float32)
                 .at[:, :VOCAB].set(w_out.T)).astype(jnp.bfloat16)
    b_out_pad = jnp.zeros((1, VOCAB_PAD), jnp.float32).at[0, :VOCAB].set(b_out)

    return dict(
        emb=emb_pad,                                   # (128, E) bf16
        pe=pe,                                         # (MAX_LEN, 1, E) f32
        wqkv=jnp.stack(wqkv_l).astype(jnp.bfloat16),   # (L, 3H, E, Dh) bf16
        bqkv=jnp.stack(bqkv_l),                        # (L, 3H, 1, Dh) f32
        wo=jnp.stack(wo_l).astype(jnp.bfloat16),       # (L, H, Dh, E) bf16
        w1=jnp.stack(w1_l).astype(jnp.bfloat16),       # (L, E, 128) bf16
        w2=jnp.stack(w2_l).astype(jnp.bfloat16),       # (L, 128, E) bf16
        vecs=jnp.stack(vec_l),                         # (L, 8, 128) f32
        w_out=w_out_pad,                               # (E, 128) bf16
        b_out=b_out_pad,                               # (1, 128) f32
    )


if __name__ == "__main__":
    key = jax.random.PRNGKey(0)
    pkey, dkey = jax.random.split(key)
    params = init_params(pkey)
    src = jax.random.randint(dkey, (BATCH, SEQ), 0, VOCAB, dtype=jnp.int32)

    logits = transformer_forward(src, params)
    logits = jax.block_until_ready(logits)
    assert logits.shape == (BATCH, SEQ, VOCAB), logits.shape
    assert bool(jnp.all(jnp.isfinite(logits)))
    print("KERNEL_OK")
</pallas_src>

<mosaic_0001>
module attributes {stable_mosaic.version = 11 : i64} {
  func.func @fused_forward_kernel(%arg0: i32, %arg1: memref<8x1xi32, #tpu.memory_space<vmem>>, %arg2: memref<8x32xf32, #tpu.memory_space<vmem>>, %arg3: memref<128x32xbf16, #tpu.memory_space<vmem>>, %arg4: memref<2x12x32x8xbf16, #tpu.memory_space<vmem>>, %arg5: memref<2x12x1x8xf32, #tpu.memory_space<vmem>>, %arg6: memref<2x4x8x32xbf16, #tpu.memory_space<vmem>>, %arg7: memref<2x32x128xbf16, #tpu.memory_space<vmem>>, %arg8: memref<2x128x32xbf16, #tpu.memory_space<vmem>>, %arg9: memref<2x8x128xf32, #tpu.memory_space<vmem>>, %arg10: memref<32x128xbf16, #tpu.memory_space<vmem>>, %arg11: memref<1x128xf32, #tpu.memory_space<vmem>>, %arg12: memref<8x128xf32, #tpu.memory_space<vmem>>) attributes {dimension_semantics = [#tpu.dimension_semantics<parallel>], iteration_bounds = array<i64: 2>, scalar_prefetch = 0 : i64, scratch_operands = 0 : i64, tpu.core_type = #tpu.core_type<tc>, window_params = [{transform_indices = @transform_0, window_bounds = array<i64: 8, 1>}, {transform_indices = @transform_1, window_bounds = array<i64: 8, 32>}, {pipeline_mode = #tpu.pipeline_mode<synchronous>, transform_indices = @transform_2, window_bounds = array<i64: 128, 32>}, {pipeline_mode = #tpu.pipeline_mode<synchronous>, transform_indices = @transform_3, window_bounds = array<i64: 2, 12, 32, 8>}, {pipeline_mode = #tpu.pipeline_mode<synchronous>, transform_indices = @transform_4, window_bounds = array<i64: 2, 12, 1, 8>}, {pipeline_mode = #tpu.pipeline_mode<synchronous>, transform_indices = @transform_5, window_bounds = array<i64: 2, 4, 8, 32>}, {pipeline_mode = #tpu.pipeline_mode<synchronous>, transform_indices = @transform_6, window_bounds = array<i64: 2, 32, 128>}, {pipeline_mode = #tpu.pipeline_mode<synchronous>, transform_indices = @transform_7, window_bounds = array<i64: 2, 128, 32>}, {pipeline_mode = #tpu.pipeline_mode<synchronous>, transform_indices = @transform_8, window_bounds = array<i64: 2, 8, 128>}, {pipeline_mode = #tpu.pipeline_mode<synchronous>, transform_indices = @transform_9, window_bounds = array<i64: 32, 128>}, {pipeline_mode = #tpu.pipeline_mode<synchronous>, transform_indices = @transform_10, window_bounds = array<i64: 1, 128>}, {transform_indices = @transform_11, window_bounds = array<i64: 8, 128>}]} {
    %c0 = arith.constant 0 : index
    %c0_0 = arith.constant 0 : index
    %0 = vector.load %arg1[%c0, %c0_0] : memref<8x1xi32, #tpu.memory_space<vmem>>, vector<8x1xi32>
    %1 = tpu.iota {dimensions = array<i32: 1>} : vector<8x128xi32>
    %2 = vector.broadcast %0 : vector<8x1xi32> to vector<8x128xi32>
    %3 = arith.cmpi eq, %1, %2 : vector<8x128xi32>
    %cst = arith.constant 1.000000e+00 : f32
    %cst_1 = arith.constant 0.000000e+00 : f32
    %4 = vector.broadcast %cst : f32 to vector<8x128xf32>
    %5 = vector.broadcast %cst_1 : f32 to vector<8x128xf32>
    %6 = arith.select %3, %4, %5 : vector<8x128xi1>, vector<8x128xf32>
    %7 = arith.truncf %6 : vector<8x128xf32> to vector<8x128xbf16>
    %c0_2 = arith.constant 0 : index
    %c0_3 = arith.constant 0 : index
    %8 = vector.load %arg3[%c0_2, %c0_3] : memref<128x32xbf16, #tpu.memory_space<vmem>>, vector<128x32xbf16>
    %cst_4 = arith.constant dense<0.000000e+00> : vector<8x32xf32>
    %9 = tpu.matmul %7, %8, %cst_4 {dimension_numbers = #tpu.dot_dimension_numbers<[1], [0], [0], [1], [0, 0, 1, 1], [], []>} : vector<8x128xbf16>, vector<128x32xbf16>, vector<8x32xf32> -> vector<8x32xf32>
    %c0_5 = arith.constant 0 : index
    %c0_6 = arith.constant 0 : index
    %10 = vector.load %arg2[%c0_5, %c0_6] : memref<8x32xf32, #tpu.memory_space<vmem>>, vector<8x32xf32>
    %11 = arith.addf %9, %10 : vector<8x32xf32>
    %c0_7 = arith.constant 0 : index
    %c0_8 = arith.constant 0 : index
    %c0_9 = arith.constant 0 : index
    %12 = vector.load %arg9[%c0_7, %c0_8, %c0_9] : memref<2x8x128xf32, #tpu.memory_space<vmem>>, vector<1x8x128xf32>
    %13 = vector.shape_cast %12 : vector<1x8x128xf32> to vector<8x128xf32>
    %14 = vector.extract_strided_slice %13 {offsets = [0, 0], sizes = [1, 32], strides = [1, 1]} : vector<8x128xf32> to vector<1x32xf32>
    %15 = vector.shape_cast %14 : vector<1x32xf32> to vector<32xf32>
    %16 = vector.extract_strided_slice %13 {offsets = [1, 0], sizes = [1, 32], strides = [1, 1]} : vector<8x128xf32> to vector<1x32xf32>
    %17 = vector.shape_cast %16 : vector<1x32xf32> to vector<32xf32>
    %18 = vector.extract_strided_slice %13 {offsets = [2, 0], sizes = [1, 32], strides = [1, 1]} : vector<8x128xf32> to vector<1x32xf32>
    %19 = vector.shape_cast %18 : vector<1x32xf32> to vector<32xf32>
    %20 = vector.extract_strided_slice %13 {offsets = [3, 0], sizes = [1, 128], strides = [1, 1]} : vector<8x128xf32> to vector<1x128xf32>
    %21 = vector.shape_cast %20 : vector<1x128xf32> to vector<128xf32>
    %22 = vector.extract_strided_slice %13 {offsets = [4, 0], sizes = [1, 32], strides = [1, 1]} : vector<8x128xf32> to vector<1x32xf32>
    %23 = vector.shape_cast %22 : vector<1x32xf32> to vector<32xf32>
    %24 = vector.extract_strided_slice %13 {offsets = [5, 0], sizes = [1, 32], strides = [1, 1]} : vector<8x128xf32> to vector<1x32xf32>
    %25 = vector.shape_cast %24 : vector<1x32xf32> to vector<32xf32>
    %26 = vector.extract_strided_slice %13 {offsets = [6, 0], sizes = [1, 32], strides = [1, 1]} : vector<8x128xf32> to vector<1x32xf32>
    %27 = vector.shape_cast %26 : vector<1x32xf32> to vector<32xf32>
    %28 = arith.truncf %11 : vector<8x32xf32> to vector<8x32xbf16>
    %29 = vector.shape_cast %28 : vector<8x32xbf16> to vector<1x8x32xbf16>
    %30 = vector.shape_cast %29 : vector<1x8x32xbf16> to vector<1x8x32xbf16>
    %31 = vector.broadcast %30 : vector<1x8x32xbf16> to vector<12x8x32xbf16>
    %c0_10 = arith.constant 0 : index
    %c0_11 = arith.constant 0 : index
    %c0_12 = arith.constant 0 : index
    %c0_13 = arith.constant 0 : index
    %32 = vector.load %arg4[%c0_10, %c0_11, %c0_12, %c0_13] : memref<2x12x32x8xbf16, #tpu.memory_space<vmem>>, vector<1x12x32x8xbf16>
    %33 = vector.shape_cast %32 : vector<1x12x32x8xbf16> to vector<12x32x8xbf16>
    "tpu.trace_start"() <{level = 10 : i32, message = "hme,hed->hmd"}> : () -> ()
    %cst_14 = arith.constant dense<0.000000e+00> : vector<12x8x8xf32>
    %34 = tpu.matmul %31, %33, %cst_14 {dimension_numbers = #tpu.dot_dimension_numbers<[2], [1], [1], [2], [0, 0, 0, 1, 1, 2], [0], [0]>} : vector<12x8x32xbf16>, vector<12x32x8xbf16>, vector<12x8x8xf32> -> vector<12x8x8xf32>
    "tpu.trace_stop"() : () -> ()
    %c0_15 = arith.constant 0 : index
    %c0_16 = arith.constant 0 : index
    %c0_17 = arith.constant 0 : index
    %c0_18 = arith.constant 0 : index
    %35 = vector.load %arg5[%c0_15, %c0_16, %c0_17, %c0_18] : memref<2x12x1x8xf32, #tpu.memory_space<vmem>>, vector<1x12x1x8xf32>
    %36 = vector.shape_cast %35 : vector<1x12x1x8xf32> to vector<12x1x8xf32>
    %37 = vector.broadcast %36 : vector<12x1x8xf32> to vector<12x8x8xf32>
    %38 = arith.addf %34, %37 : vector<12x8x8xf32>
    %39 = vector.extract_strided_slice %38 {offsets = [0, 0, 0], sizes = [4, 8, 8], strides = [1, 1, 1]} : vector<12x8x8xf32> to vector<4x8x8xf32>
    %40 = vector.extract_strided_slice %38 {offsets = [4, 0, 0], sizes = [4, 8, 8], strides = [1, 1, 1]} : vector<12x8x8xf32> to vector<4x8x8xf32>
    %41 = vector.extract_strided_slice %38 {offsets = [8, 0, 0], sizes = [4, 8, 8], strides = [1, 1, 1]} : vector<12x8x8xf32> to vector<4x8x8xf32>
    "tpu.trace_start"() <{level = 10 : i32, message = "hsd,htd->hst"}> : () -> ()
    %cst_19 = arith.constant dense<0.000000e+00> : vector<4x8x8xf32>
    %42 = tpu.matmul %39, %40, %cst_19 {dimension_numbers = #tpu.dot_dimension_numbers<[2], [2], [1], [1], [0, 0, 0, 1, 1, 1], [0], [0]>} : vector<4x8x8xf32>, vector<4x8x8xf32>, vector<4x8x8xf32> -> vector<4x8x8xf32>
    "tpu.trace_stop"() : () -> ()
    %cst_20 = arith.constant dense<0xFF800000> : vector<4x8xf32>
    %43 = vector.multi_reduction <maximumf>, %42, %cst_20 [2] : vector<4x8x8xf32> to vector<4x8xf32>
    %44 = vector.shape_cast %43 : vector<4x8xf32> to vector<4x8x1xf32>
    %45 = vector.broadcast %44 : vector<4x8x1xf32> to vector<4x8x8xf32>
    %46 = arith.subf %42, %45 : vector<4x8x8xf32>
    %47 = math.exp %46 : vector<4x8x8xf32>
    %cst_21 = arith.constant dense<0.000000e+00> : vector<4x8xf32>
    %48 = vector.multi_reduction <add>, %47, %cst_21 [2] : vector<4x8x8xf32> to vector<4x8xf32>
    %49 = vector.shape_cast %48 : vector<4x8xf32> to vector<4x8x1xf32>
    %50 = tpu.reciprocal %49 {approx = true} : vector<4x8x1xf32> -> vector<4x8x1xf32>
    %51 = vector.broadcast %50 : vector<4x8x1xf32> to vector<4x8x8xf32>
    %52 = arith.mulf %47, %51 : vector<4x8x8xf32>
    "tpu.trace_start"() <{level = 10 : i32, message = "hst,htd->hsd"}> : () -> ()
    %cst_22 = arith.constant dense<0.000000e+00> : vector<4x8x8xf32>
    %53 = tpu.matmul %52, %41, %cst_22 {dimension_numbers = #tpu.dot_dimension_numbers<[2], [1], [1], [2], [0, 0, 0, 1, 1, 2], [0], [0]>} : vector<4x8x8xf32>, vector<4x8x8xf32>, vector<4x8x8xf32> -> vector<4x8x8xf32>
    "tpu.trace_stop"() : () -> ()
    %54 = arith.truncf %53 : vector<4x8x8xf32> to vector<4x8x8xbf16>
    %c0_23 = arith.constant 0 : index
    %c0_24 = arith.constant 0 : index
    %c0_25 = arith.constant 0 : index
    %c0_26 = arith.constant 0 : index
    %55 = vector.load %arg6[%c0_23, %c0_24, %c0_25, %c0_26] : memref<2x4x8x32xbf16, #tpu.memory_space<vmem>>, vector<1x4x8x32xbf16>
    %56 = vector.shape_cast %55 : vector<1x4x8x32xbf16> to vector<4x8x32xbf16>
    "tpu.trace_start"() <{level = 10 : i32, message = "hsd,hde->hse"}> : () -> ()
    %cst_27 = arith.constant dense<0.000000e+00> : vector<4x8x32xf32>
    %57 = tpu.matmul %54, %56, %cst_27 {dimension_numbers = #tpu.dot_dimension_numbers<[2], [1], [1], [2], [0, 0, 0, 1, 1, 2], [0], [0]>} : vector<4x8x8xbf16>, vector<4x8x32xbf16>, vector<4x8x32xf32> -> vector<4x8x32xf32>
    "tpu.trace_stop"() : () -> ()
    %cst_28 = arith.constant dense<0.000000e+00> : vector<8x32xf32>
    %58 = vector.multi_reduction <add>, %57, %cst_28 [0] : vector<4x8x32xf32> to vector<8x32xf32>
    %59 = vector.shape_cast %15 : vector<32xf32> to vector<1x32xf32>
    %60 = vector.broadcast %59 : vector<1x32xf32> to vector<8x32xf32>
    %61 = arith.addf %58, %60 : vector<8x32xf32>
    %62 = arith.addf %11, %61 : vector<8x32xf32>
    %cst_29 = arith.constant dense<0.000000e+00> : vector<8xf32>
    %63 = vector.multi_reduction <add>, %62, %cst_29 [1] : vector<8x32xf32> to vector<8xf32>
    %64 = vector.shape_cast %63 : vector<8xf32> to vector<8x1xf32>
    %cst_30 = arith.constant 3.200000e+01 : f32
    %65 = vector.broadcast %cst_30 : f32 to vector<8x1xf32>
    %66 = arith.divf %64, %65 : vector<8x1xf32>
    %67 = vector.broadcast %66 : vector<8x1xf32> to vector<8x32xf32>
    %68 = arith.subf %62, %67 : vector<8x32xf32>
    %69 = arith.mulf %68, %68 : vector<8x32xf32>
    %cst_31 = arith.constant dense<0.000000e+00> : vector<8xf32>
    %70 = vector.multi_reduction <add>, %69, %cst_31 [1] : vector<8x32xf32> to vector<8xf32>
    %71 = vector.shape_cast %70 : vector<8xf32> to vector<8x1xf32>
    %cst_32 = arith.constant 3.200000e+01 : f32
    %72 = vector.broadcast %cst_32 : f32 to vector<8x1xf32>
    %73 = arith.divf %71, %72 : vector<8x1xf32>
    %74 = vector.broadcast %66 : vector<8x1xf32> to vector<8x32xf32>
    %75 = arith.subf %62, %74 : vector<8x32xf32>
    %cst_33 = arith.constant 9.99999974E-6 : f32
    %76 = vector.broadcast %cst_33 : f32 to vector<8x1xf32>
    %77 = arith.addf %73, %76 : vector<8x1xf32>
    %78 = math.rsqrt %77 : vector<8x1xf32>
    %79 = vector.broadcast %78 : vector<8x1xf32> to vector<8x32xf32>
    %80 = arith.mulf %75, %79 : vector<8x32xf32>
    %81 = vector.shape_cast %17 : vector<32xf32> to vector<1x32xf32>
    %82 = vector.broadcast %81 : vector<1x32xf32> to vector<8x32xf32>
    %83 = arith.mulf %80, %82 : vector<8x32xf32>
    %84 = vector.shape_cast %19 : vector<32xf32> to vector<1x32xf32>
    %85 = vector.broadcast %84 : vector<1x32xf32> to vector<8x32xf32>
    %86 = arith.addf %83, %85 : vector<8x32xf32>
    %87 = arith.truncf %86 : vector<8x32xf32> to vector<8x32xbf16>
    %c0_34 = arith.constant 0 : index
    %c0_35 = arith.constant 0 : index
    %c0_36 = arith.constant 0 : index
    %88 = vector.load %arg7[%c0_34, %c0_35, %c0_36] : memref<2x32x128xbf16, #tpu.memory_space<vmem>>, vector<1x32x128xbf16>
    %89 = vector.shape_cast %88 : vector<1x32x128xbf16> to vector<32x128xbf16>
    %cst_37 = arith.constant dense<0.000000e+00> : vector<8x128xf32>
    %90 = tpu.matmul %87, %89, %cst_37 {dimension_numbers = #tpu.dot_dimension_numbers<[1], [0], [0], [1], [0, 0, 1, 1], [], []>} : vector<8x32xbf16>, vector<32x128xbf16>, vector<8x128xf32> -> vector<8x128xf32>
    %91 = vector.shape_cast %21 : vector<128xf32> to vector<1x128xf32>
    %92 = vector.broadcast %91 : vector<1x128xf32> to vector<8x128xf32>
    %93 = arith.addf %90, %92 : vector<8x128xf32>
    %cst_38 = arith.constant 0.000000e+00 : f32
    %94 = vector.broadcast %cst_38 : f32 to vector<8x128xf32>
    %95 = arith.maximumf %93, %94 : vector<8x128xf32>
    %96 = arith.truncf %95 : vector<8x128xf32> to vector<8x128xbf16>
    %c0_39 = arith.constant 0 : index
    %c0_40 = arith.constant 0 : index
    %c0_41 = arith.constant 0 : index
    %97 = vector.load %arg8[%c0_39, %c0_40, %c0_41] : memref<2x128x32xbf16, #tpu.memory_space<vmem>>, vector<1x128x32xbf16>
    %98 = vector.shape_cast %97 : vector<1x128x32xbf16> to vector<128x32xbf16>
    %cst_42 = arith.constant dense<0.000000e+00> : vector<8x32xf32>
    %99 = tpu.matmul %96, %98, %cst_42 {dimension_numbers = #tpu.dot_dimension_numbers<[1], [0], [0], [1], [0, 0, 1, 1], [], []>} : vector<8x128xbf16>, vector<128x32xbf16>, vector<8x32xf32> -> vector<8x32xf32>
    %100 = vector.shape_cast %23 : vector<32xf32> to vector<1x32xf32>
    %101 = vector.broadcast %100 : vector<1x32xf32> to vector<8x32xf32>
    %102 = arith.addf %99, %101 : vector<8x32xf32>
    %103 = arith.addf %86, %102 : vector<8x32xf32>
    %cst_43 = arith.constant dense<0.000000e+00> : vector<8xf32>
    %104 = vector.multi_reduction <add>, %103, %cst_43 [1] : vector<8x32xf32> to vector<8xf32>
    %105 = vector.shape_cast %104 : vector<8xf32> to vector<8x1xf32>
    %cst_44 = arith.constant 3.200000e+01 : f32
    %106 = vector.broadcast %cst_44 : f32 to vector<8x1xf32>
    %107 = arith.divf %105, %106 : vector<8x1xf32>
    %108 = vector.broadcast %107 : vector<8x1xf32> to vector<8x32xf32>
    %109 = arith.subf %103, %108 : vector<8x32xf32>
    %110 = arith.mulf %109, %109 : vector<8x32xf32>
    %cst_45 = arith.constant dense<0.000000e+00> : vector<8xf32>
    %111 = vector.multi_reduction <add>, %110, %cst_45 [1] : vector<8x32xf32> to vector<8xf32>
    %112 = vector.shape_cast %111 : vector<8xf32> to vector<8x1xf32>
    %cst_46 = arith.constant 3.200000e+01 : f32
    %113 = vector.broadcast %cst_46 : f32 to vector<8x1xf32>
    %114 = arith.divf %112, %113 : vector<8x1xf32>
    %115 = vector.broadcast %107 : vector<8x1xf32> to vector<8x32xf32>
    %116 = arith.subf %103, %115 : vector<8x32xf32>
    %cst_47 = arith.constant 9.99999974E-6 : f32
    %117 = vector.broadcast %cst_47 : f32 to vector<8x1xf32>
    %118 = arith.addf %114, %117 : vector<8x1xf32>
    %119 = math.rsqrt %118 : vector<8x1xf32>
    %120 = vector.broadcast %119 : vector<8x1xf32> to vector<8x32xf32>
    %121 = arith.mulf %116, %120 : vector<8x32xf32>
    %122 = vector.shape_cast %25 : vector<32xf32> to vector<1x32xf32>
    %123 = vector.broadcast %122 : vector<1x32xf32> to vector<8x32xf32>
    %124 = arith.mulf %121, %123 : vector<8x32xf32>
    %125 = vector.shape_cast %27 : vector<32xf32> to vector<1x32xf32>
    %126 = vector.broadcast %125 : vector<1x32xf32> to vector<8x32xf32>
    %127 = arith.addf %124, %126 : vector<8x32xf32>
    %c1 = arith.constant 1 : index
    %c0_48 = arith.constant 0 : index
    %c0_49 = arith.constant 0 : index
    %128 = vector.load %arg9[%c1, %c0_48, %c0_49] : memref<2x8x128xf32, #tpu.memory_space<vmem>>, vector<1x8x128xf32>
    %129 = vector.shape_cast %128 : vector<1x8x128xf32> to vector<8x128xf32>
    %130 = vector.extract_strided_slice %129 {offsets = [0, 0], sizes = [1, 32], strides = [1, 1]} : vector<8x128xf32> to vector<1x32xf32>
    %131 = vector.shape_cast %130 : vector<1x32xf32> to vector<32xf32>
    %132 = vector.extract_strided_slice %129 {offsets = [1, 0], sizes = [1, 32], strides = [1, 1]} : vector<8x128xf32> to vector<1x32xf32>
    %133 = vector.shape_cast %132 : vector<1x32xf32> to vector<32xf32>
    %134 = vector.extract_strided_slice %129 {offsets = [2, 0], sizes = [1, 32], strides = [1, 1]} : vector<8x128xf32> to vector<1x32xf32>
    %135 = vector.shape_cast %134 : vector<1x32xf32> to vector<32xf32>
    %136 = vector.extract_strided_slice %129 {offsets = [3, 0], sizes = [1, 128], strides = [1, 1]} : vector<8x128xf32> to vector<1x128xf32>
    %137 = vector.shape_cast %136 : vector<1x128xf32> to vector<128xf32>
    %138 = vector.extract_strided_slice %129 {offsets = [4, 0], sizes = [1, 32], strides = [1, 1]} : vector<8x128xf32> to vector<1x32xf32>
    %139 = vector.shape_cast %138 : vector<1x32xf32> to vector<32xf32>
    %140 = vector.extract_strided_slice %129 {offsets = [5, 0], sizes = [1, 32], strides = [1, 1]} : vector<8x128xf32> to vector<1x32xf32>
    %141 = vector.shape_cast %140 : vector<1x32xf32> to vector<32xf32>
    %142 = vector.extract_strided_slice %129 {offsets = [6, 0], sizes = [1, 32], strides = [1, 1]} : vector<8x128xf32> to vector<1x32xf32>
    %143 = vector.shape_cast %142 : vector<1x32xf32> to vector<32xf32>
    %144 = arith.truncf %127 : vector<8x32xf32> to vector<8x32xbf16>
    %145 = vector.shape_cast %144 : vector<8x32xbf16> to vector<1x8x32xbf16>
    %146 = vector.shape_cast %145 : vector<1x8x32xbf16> to vector<1x8x32xbf16>
    %147 = vector.broadcast %146 : vector<1x8x32xbf16> to vector<12x8x32xbf16>
    %c1_50 = arith.constant 1 : index
    %c0_51 = arith.constant 0 : index
    %c0_52 = arith.constant 0 : index
    %c0_53 = arith.constant 0 : index
    %148 = vector.load %arg4[%c1_50, %c0_51, %c0_52, %c0_53] : memref<2x12x32x8xbf16, #tpu.memory_space<vmem>>, vector<1x12x32x8xbf16>
    %149 = vector.shape_cast %148 : vector<1x12x32x8xbf16> to vector<12x32x8xbf16>
    "tpu.trace_start"() <{level = 10 : i32, message = "hme,hed->hmd"}> : () -> ()
    %cst_54 = arith.constant dense<0.000000e+00> : vector<12x8x8xf32>
    %150 = tpu.matmul %147, %149, %cst_54 {dimension_numbers = #tpu.dot_dimension_numbers<[2], [1], [1], [2], [0, 0, 0, 1, 1, 2], [0], [0]>} : vector<12x8x32xbf16>, vector<12x32x8xbf16>, vector<12x8x8xf32> -> vector<12x8x8xf32>
    "tpu.trace_stop"() : () -> ()
    %c1_55 = arith.constant 1 : index
    %c0_56 = arith.constant 0 : index
    %c0_57 = arith.constant 0 : index
    %c0_58 = arith.constant 0 : index
    %151 = vector.load %arg5[%c1_55, %c0_56, %c0_57, %c0_58] : memref<2x12x1x8xf32, #tpu.memory_space<vmem>>, vector<1x12x1x8xf32>
    %152 = vector.shape_cast %151 : vector<1x12x1x8xf32> to vector<12x1x8xf32>
    %153 = vector.broadcast %152 : vector<12x1x8xf32> to vector<12x8x8xf32>
    %154 = arith.addf %150, %153 : vector<12x8x8xf32>
    %155 = vector.extract_strided_slice %154 {offsets = [0, 0, 0], sizes = [4, 8, 8], strides = [1, 1, 1]} : vector<12x8x8xf32> to vector<4x8x8xf32>
    %156 = vector.extract_strided_slice %154 {offsets = [4, 0, 0], sizes = [4, 8, 8], strides = [1, 1, 1]} : vector<12x8x8xf32> to vector<4x8x8xf32>
    %157 = vector.extract_strided_slice %154 {offsets = [8, 0, 0], sizes = [4, 8, 8], strides = [1, 1, 1]} : vector<12x8x8xf32> to vector<4x8x8xf32>
    "tpu.trace_start"() <{level = 10 : i32, message = "hsd,htd->hst"}> : () -> ()
    %cst_59 = arith.constant dense<0.000000e+00> : vector<4x8x8xf32>
    %158 = tpu.matmul %155, %156, %cst_59 {dimension_numbers = #tpu.dot_dimension_numbers<[2], [2], [1], [1], [0, 0, 0, 1, 1, 1], [0], [0]>} : vector<4x8x8xf32>, vector<4x8x8xf32>, vector<4x8x8xf32> -> vector<4x8x8xf32>
    "tpu.trace_stop"() : () -> ()
    %cst_60 = arith.constant dense<0xFF800000> : vector<4x8xf32>
    %159 = vector.multi_reduction <maximumf>, %158, %cst_60 [2] : vector<4x8x8xf32> to vector<4x8xf32>
    %160 = vector.shape_cast %159 : vector<4x8xf32> to vector<4x8x1xf32>
    %161 = vector.broadcast %160 : vector<4x8x1xf32> to vector<4x8x8xf32>
    %162 = arith.subf %158, %161 : vector<4x8x8xf32>
    %163 = math.exp %162 : vector<4x8x8xf32>
    %cst_61 = arith.constant dense<0.000000e+00> : vector<4x8xf32>
    %164 = vector.multi_reduction <add>, %163, %cst_61 [2] : vector<4x8x8xf32> to vector<4x8xf32>
    %165 = vector.shape_cast %164 : vector<4x8xf32> to vector<4x8x1xf32>
    %166 = tpu.reciprocal %165 {approx = true} : vector<4x8x1xf32> -> vector<4x8x1xf32>
    %167 = vector.broadcast %166 : vector<4x8x1xf32> to vector<4x8x8xf32>
    %168 = arith.mulf %163, %167 : vector<4x8x8xf32>
    "tpu.trace_start"() <{level = 10 : i32, message = "hst,htd->hsd"}> : () -> ()
    %cst_62 = arith.constant dense<0.000000e+00> : vector<4x8x8xf32>
    %169 = tpu.matmul %168, %157, %cst_62 {dimension_numbers = #tpu.dot_dimension_numbers<[2], [1], [1], [2], [0, 0, 0, 1, 1, 2], [0], [0]>} : vector<4x8x8xf32>, vector<4x8x8xf32>, vector<4x8x8xf32> -> vector<4x8x8xf32>
    "tpu.trace_stop"() : () -> ()
    %170 = arith.truncf %169 : vector<4x8x8xf32> to vector<4x8x8xbf16>
    %c1_63 = arith.constant 1 : index
    %c0_64 = arith.constant 0 : index
    %c0_65 = arith.constant 0 : index
    %c0_66 = arith.constant 0 : index
    %171 = vector.load %arg6[%c1_63, %c0_64, %c0_65, %c0_66] : memref<2x4x8x32xbf16, #tpu.memory_space<vmem>>, vector<1x4x8x32xbf16>
    %172 = vector.shape_cast %171 : vector<1x4x8x32xbf16> to vector<4x8x32xbf16>
    "tpu.trace_start"() <{level = 10 : i32, message = "hsd,hde->hse"}> : () -> ()
    %cst_67 = arith.constant dense<0.000000e+00> : vector<4x8x32xf32>
    %173 = tpu.matmul %170, %172, %cst_67 {dimension_numbers = #tpu.dot_dimension_numbers<[2], [1], [1], [2], [0, 0, 0, 1, 1, 2], [0], [0]>} : vector<4x8x8xbf16>, vector<4x8x32xbf16>, vector<4x8x32xf32> -> vector<4x8x32xf32>
    "tpu.trace_stop"() : () -> ()
    %cst_68 = arith.constant dense<0.000000e+00> : vector<8x32xf32>
    %174 = vector.multi_reduction <add>, %173, %cst_68 [0] : vector<4x8x32xf32> to vector<8x32xf32>
    %175 = vector.shape_cast %131 : vector<32xf32> to vector<1x32xf32>
    %176 = vector.broadcast %175 : vector<1x32xf32> to vector<8x32xf32>
    %177 = arith.addf %174, %176 : vector<8x32xf32>
    %178 = arith.addf %127, %177 : vector<8x32xf32>
    %cst_69 = arith.constant dense<0.000000e+00> : vector<8xf32>
    %179 = vector.multi_reduction <add>, %178, %cst_69 [1] : vector<8x32xf32> to vector<8xf32>
    %180 = vector.shape_cast %179 : vector<8xf32> to vector<8x1xf32>
    %cst_70 = arith.constant 3.200000e+01 : f32
    %181 = vector.broadcast %cst_70 : f32 to vector<8x1xf32>
    %182 = arith.divf %180, %181 : vector<8x1xf32>
    %183 = vector.broadcast %182 : vector<8x1xf32> to vector<8x32xf32>
    %184 = arith.subf %178, %183 : vector<8x32xf32>
    %185 = arith.mulf %184, %184 : vector<8x32xf32>
    %cst_71 = arith.constant dense<0.000000e+00> : vector<8xf32>
    %186 = vector.multi_reduction <add>, %185, %cst_71 [1] : vector<8x32xf32> to vector<8xf32>
    %187 = vector.shape_cast %186 : vector<8xf32> to vector<8x1xf32>
    %cst_72 = arith.constant 3.200000e+01 : f32
    %188 = vector.broadcast %cst_72 : f32 to vector<8x1xf32>
    %189 = arith.divf %187, %188 : vector<8x1xf32>
    %190 = vector.broadcast %182 : vector<8x1xf32> to vector<8x32xf32>
    %191 = arith.subf %178, %190 : vector<8x32xf32>
    %cst_73 = arith.constant 9.99999974E-6 : f32
    %192 = vector.broadcast %cst_73 : f32 to vector<8x1xf32>
    %193 = arith.addf %189, %192 : vector<8x1xf32>
    %194 = math.rsqrt %193 : vector<8x1xf32>
    %195 = vector.broadcast %194 : vector<8x1xf32> to vector<8x32xf32>
    %196 = arith.mulf %191, %195 : vector<8x32xf32>
    %197 = vector.shape_cast %133 : vector<32xf32> to vector<1x32xf32>
    %198 = vector.broadcast %197 : vector<1x32xf32> to vector<8x32xf32>
    %199 = arith.mulf %196, %198 : vector<8x32xf32>
    %200 = vector.shape_cast %135 : vector<32xf32> to vector<1x32xf32>
    %201 = vector.broadcast %200 : vector<1x32xf32> to vector<8x32xf32>
    %202 = arith.addf %199, %201 : vector<8x32xf32>
    %203 = arith.truncf %202 : vector<8x32xf32> to vector<8x32xbf16>
    %c1_74 = arith.constant 1 : index
    %c0_75 = arith.constant 0 : index
    %c0_76 = arith.constant 0 : index
    %204 = vector.load %arg7[%c1_74, %c0_75, %c0_76] : memref<2x32x128xbf16, #tpu.memory_space<vmem>>, vector<1x32x128xbf16>
    %205 = vector.shape_cast %204 : vector<1x32x128xbf16> to vector<32x128xbf16>
    %cst_77 = arith.constant dense<0.000000e+00> : vector<8x128xf32>
    %206 = tpu.matmul %203, %205, %cst_77 {dimension_numbers = #tpu.dot_dimension_numbers<[1], [0], [0], [1], [0, 0, 1, 1], [], []>} : vector<8x32xbf16>, vector<32x128xbf16>, vector<8x128xf32> -> vector<8x128xf32>
    %207 = vector.shape_cast %137 : vector<128xf32> to vector<1x128xf32>
    %208 = vector.broadcast %207 : vector<1x128xf32> to vector<8x128xf32>
    %209 = arith.addf %206, %208 : vector<8x128xf32>
    %cst_78 = arith.constant 0.000000e+00 : f32
    %210 = vector.broadcast %cst_78 : f32 to vector<8x128xf32>
    %211 = arith.maximumf %209, %210 : vector<8x128xf32>
    %212 = arith.truncf %211 : vector<8x128xf32> to vector<8x128xbf16>
    %c1_79 = arith.constant 1 : index
    %c0_80 = arith.constant 0 : index
    %c0_81 = arith.constant 0 : index
    %213 = vector.load %arg8[%c1_79, %c0_80, %c0_81] : memref<2x128x32xbf16, #tpu.memory_space<vmem>>, vector<1x128x32xbf16>
    %214 = vector.shape_cast %213 : vector<1x128x32xbf16> to vector<128x32xbf16>
    %cst_82 = arith.constant dense<0.000000e+00> : vector<8x32xf32>
    %215 = tpu.matmul %212, %214, %cst_82 {dimension_numbers = #tpu.dot_dimension_numbers<[1], [0], [0], [1], [0, 0, 1, 1], [], []>} : vector<8x128xbf16>, vector<128x32xbf16>, vector<8x32xf32> -> vector<8x32xf32>
    %216 = vector.shape_cast %139 : vector<32xf32> to vector<1x32xf32>
    %217 = vector.broadcast %216 : vector<1x32xf32> to vector<8x32xf32>
    %218 = arith.addf %215, %217 : vector<8x32xf32>
    %219 = arith.addf %202, %218 : vector<8x32xf32>
    %cst_83 = arith.constant dense<0.000000e+00> : vector<8xf32>
    %220 = vector.multi_reduction <add>, %219, %cst_83 [1] : vector<8x32xf32> to vector<8xf32>
    %221 = vector.shape_cast %220 : vector<8xf32> to vector<8x1xf32>
    %cst_84 = arith.constant 3.200000e+01 : f32
    %222 = vector.broadcast %cst_84 : f32 to vector<8x1xf32>
    %223 = arith.divf %221, %222 : vector<8x1xf32>
    %224 = vector.broadcast %223 : vector<8x1xf32> to vector<8x32xf32>
    %225 = arith.subf %219, %224 : vector<8x32xf32>
    %226 = arith.mulf %225, %225 : vector<8x32xf32>
    %cst_85 = arith.constant dense<0.000000e+00> : vector<8xf32>
    %227 = vector.multi_reduction <add>, %226, %cst_85 [1] : vector<8x32xf32> to vector<8xf32>
    %228 = vector.shape_cast %227 : vector<8xf32> to vector<8x1xf32>
    %cst_86 = arith.constant 3.200000e+01 : f32
    %229 = vector.broadcast %cst_86 : f32 to vector<8x1xf32>
    %230 = arith.divf %228, %229 : vector<8x1xf32>
    %231 = vector.broadcast %223 : vector<8x1xf32> to vector<8x32xf32>
    %232 = arith.subf %219, %231 : vector<8x32xf32>
    %cst_87 = arith.constant 9.99999974E-6 : f32
    %233 = vector.broadcast %cst_87 : f32 to vector<8x1xf32>
    %234 = arith.addf %230, %233 : vector<8x1xf32>
    %235 = math.rsqrt %234 : vector<8x1xf32>
    %236 = vector.broadcast %235 : vector<8x1xf32> to vector<8x32xf32>
    %237 = arith.mulf %232, %236 : vector<8x32xf32>
    %238 = vector.shape_cast %141 : vector<32xf32> to vector<1x32xf32>
    %239 = vector.broadcast %238 : vector<1x32xf32> to vector<8x32xf32>
    %240 = arith.mulf %237, %239 : vector<8x32xf32>
    %241 = vector.shape_cast %143 : vector<32xf32> to vector<1x32xf32>
    %242 = vector.broadcast %241 : vector<1x32xf32> to vector<8x32xf32>
    %243 = arith.addf %240, %242 : vector<8x32xf32>
    %244 = arith.truncf %243 : vector<8x32xf32> to vector<8x32xbf16>
    %c0_88 = arith.constant 0 : index
    %c0_89 = arith.constant 0 : index
    %245 = vector.load %arg10[%c0_88, %c0_89] : memref<32x128xbf16, #tpu.memory_space<vmem>>, vector<32x128xbf16>
    %cst_90 = arith.constant dense<0.000000e+00> : vector<8x128xf32>
    %246 = tpu.matmul %244, %245, %cst_90 {dimension_numbers = #tpu.dot_dimension_numbers<[1], [0], [0], [1], [0, 0, 1, 1], [], []>} : vector<8x32xbf16>, vector<32x128xbf16>, vector<8x128xf32> -> vector<8x128xf32>
    %c0_91 = arith.constant 0 : index
    %c0_92 = arith.constant 0 : index
    %247 = vector.load %arg11[%c0_91, %c0_92] : memref<1x128xf32, #tpu.memory_space<vmem>>, vector<1x128xf32>
    %248 = vector.broadcast %247 : vector<1x128xf32> to vector<8x128xf32>
    %249 = arith.addf %246, %248 : vector<8x128xf32>
    %c0_93 = arith.constant 0 : index
    %c0_94 = arith.constant 0 : index
    %250 = vector.load %arg12[%c0_93, %c0_94] : memref<8x128xf32, #tpu.memory_space<vmem>>, vector<8x128xf32>
    tpu.vector_store %arg12[%c0_93, %c0_94], %249 {strides = array<i32>} : memref<8x128xf32, #tpu.memory_space<vmem>>, vector<8x128xf32>,
    return
  }
  func.func @transform_0(%arg0: i32) -> (i32, i32) {
    %c0_i32 = arith.constant 0 : i32
    %c0_i32_0 = arith.constant 0 : i32
    return %arg0, %c0_i32 : i32, i32
  }
  func.func @transform_1(%arg0: i32) -> (i32, i32) {
    %c0_i32 = arith.constant 0 : i32
    %c0_i32_0 = arith.constant 0 : i32
    return %arg0, %c0_i32 : i32, i32
  }
  func.func @transform_2(%arg0: i32) -> (i32, i32) {
    %c0_i32 = arith.constant 0 : i32
    %c0_i32_0 = arith.constant 0 : i32
    %c0_i32_1 = arith.constant 0 : i32
    return %c0_i32, %c0_i32_0 : i32, i32
  }
  func.func @transform_3(%arg0: i32) -> (i32, i32, i32, i32) {
    %c0_i32 = arith.constant 0 : i32
    %c0_i32_0 = arith.constant 0 : i32
    %c0_i32_1 = arith.constant 0 : i32
    %c0_i32_2 = arith.constant 0 : i32
    %c0_i32_3 = arith.constant 0 : i32
    return %c0_i32, %c0_i32_0, %c0_i32_1, %c0_i32_2 : i32, i32, i32, i32
  }
  func.func @transform_4(%arg0: i32) -> (i32, i32, i32, i32) {
    %c0_i32 = arith.constant 0 : i32
    %c0_i32_0 = arith.constant 0 : i32
    %c0_i32_1 = arith.constant 0 : i32
    %c0_i32_2 = arith.constant 0 : i32
    %c0_i32_3 = arith.constant 0 : i32
    return %c0_i32, %c0_i32_0, %c0_i32_1, %c0_i32_2 : i32, i32, i32, i32
  }
  func.func @transform_5(%arg0: i32) -> (i32, i32, i32, i32) {
    %c0_i32 = arith.constant 0 : i32
    %c0_i32_0 = arith.constant 0 : i32
    %c0_i32_1 = arith.constant 0 : i32
    %c0_i32_2 = arith.constant 0 : i32
    %c0_i32_3 = arith.constant 0 : i32
    return %c0_i32, %c0_i32_0, %c0_i32_1, %c0_i32_2 : i32, i32, i32, i32
  }
  func.func @transform_6(%arg0: i32) -> (i32, i32, i32) {
    %c0_i32 = arith.constant 0 : i32
    %c0_i32_0 = arith.constant 0 : i32
    %c0_i32_1 = arith.constant 0 : i32
    %c0_i32_2 = arith.constant 0 : i32
    return %c0_i32, %c0_i32_0, %c0_i32_1 : i32, i32, i32
  }
  func.func @transform_7(%arg0: i32) -> (i32, i32, i32) {
    %c0_i32 = arith.constant 0 : i32
    %c0_i32_0 = arith.constant 0 : i32
    %c0_i32_1 = arith.constant 0 : i32
    %c0_i32_2 = arith.constant 0 : i32
    return %c0_i32, %c0_i32_0, %c0_i32_1 : i32, i32, i32
  }
  func.func @transform_8(%arg0: i32) -> (i32, i32, i32) {
    %c0_i32 = arith.constant 0 : i32
    %c0_i32_0 = arith.constant 0 : i32
    %c0_i32_1 = arith.constant 0 : i32
    %c0_i32_2 = arith.constant 0 : i32
    return %c0_i32, %c0_i32_0, %c0_i32_1 : i32, i32, i32
  }
  func.func @transform_9(%arg0: i32) -> (i32, i32) {
    %c0_i32 = arith.constant 0 : i32
    %c0_i32_0 = arith.constant 0 : i32
    %c0_i32_1 = arith.constant 0 : i32
    return %c0_i32, %c0_i32_0 : i32, i32
  }
  func.func @transform_10(%arg0: i32) -> (i32, i32) {
    %c0_i32 = arith.constant 0 : i32
    %c0_i32_0 = arith.constant 0 : i32
    %c0_i32_1 = arith.constant 0 : i32
    return %c0_i32, %c0_i32_0 : i32, i32
  }
  func.func @transform_11(%arg0: i32) -> (i32, i32) {
    %c0_i32 = arith.constant 0 : i32
    %c0_i32_0 = arith.constant 0 : i32
    return %arg0, %c0_i32 : i32, i32
  }
}

</mosaic_0001>

<bundles_post_ra>
// kernel: tpu_custom_call.1
= control target key start
LH: loop header
LB: loop body
LE: loop exit
PB: predicated region body
PF: predicated region fallthrough
CT: control target
= control target key end

     0   :  { %16 = vsyncpa [#allocation3], 0  ;;  %s6307_s0 = inlined_call_operand.vmem [shape: s32[16,1], index: 0, kind: input, shape index: {}]   ;;  %s6308_s1 = inlined_call_operand.vmem [shape: f32[16,32], index: 1, kind: input, shape index: {}]   ;;  %s6309_s2 = inlined_call_operand.vmem [shape: bf16[128,32], index: 2, kind: input, shape index: {}]   ;;  %s6310_s3 = inlined_call_operand.vmem [shape: bf16[2,12,32,8], index: 3, kind: input, shape index: {}]   ;;  %s6311_s4 = inlined_call_operand.vmem [shape: f32[2,12,1,8], index: 4, kind: input, shape index: {}]   ;;  %s6312_s5 = inlined_call_operand.vmem [shape: bf16[2,4,8,32], index: 5, kind: input, shape index: {}]   ;;  %s6313_s6 = inlined_call_operand.vmem [shape: bf16[2,32,128], index: 6, kind: input, shape index: {}]   ;;  %s6314_s7 = inlined_call_operand.vmem [shape: bf16[2,128,32], index: 7, kind: input, shape index: {}]   ;;  %s6315_s8 = inlined_call_operand.vmem [shape: f32[2,8,128], index: 8, kind: input, shape index: {}]   ;;  %s6316_s9 = inlined_call_operand.vmem [shape: bf16[32,128], index: 9, kind: input, shape index: {}]   ;;  %s6317_s10 = inlined_call_operand.vmem [shape: f32[1,128], index: 10, kind: input, shape index: {}]   ;;  %s6318_s11 = inlined_call_operand.hbm [shape: f32[16,128], index: 11, kind: output, shape index: {}]  }
   0x1   :  { %18 = vsyncpa [#allocation3 + $0x1], 0  ;;  %s5442_s17 = smov 0   ;;  %s5444_s18 = smov 0  }
   0x2   :  { %s5446_s19 = smov 0   ;;  %s5448_s20 = smov 0  }
   0x3 LB: > { %s5463_s21 = sadd.s32 4294967295, %s5375_s20   ;;  %s4331_s22 = sadd.s32 4294967294, %s5375_s20   ;;  %s5375_s20 = sphi %s5448_s20, %s6324_s20   ;;  %s5371_s19 = sphi %s5446_s19, %s6323_s19   ;;  %s5367_s18 = sphi %s5444_s18, %s6322_s18   ;;  %s5363_s17 = sphi %s5442_s17, %s6321_s17  }
   0x4   : > { %s5467_s23 = sadd.s32 1, %s5375_s20   ;;  %s272_s24 = sadd.s32 1, %s5371_s19 }
   0x5   : > { %s269_s25 = ssub.s32 %s5375_s20, %s5467_s23  ;;  %p282_p0 = scmp.ne.s32.totalorder %s5371_s19, %s5367_s18 }
   0x6   : > { %p270_p1 = scmp.eq.s32.totalorder %s269_s25, 0  ;;  %p283_p2 = scmp.eq.s32.totalorder %s5463_s21, 1 }
   0x7   : > { %p288_p3 = scmp.ne.s32.totalorder %s5367_s18, %s5363_s17  ;;  %p289_p4 = scmp.eq.s32.totalorder %s4331_s22, 1 }
   0x8   : > { %s5478_s26 = scalar_select %p270_p1, %s5371_s19, %s272_s24  }
   0x9   : > { %p5480_p5 = por %p283_p2, %p282_p0  ;;  %p5484_p6 = por %p289_p4, %p288_p3 }
   0xa   : > { %p4334_p7 = scmp.ge.s32.totalorder %s5375_s20, 1  ;;  %p348_p8 = scmp.lt.s32.totalorder %s5375_s20, 3 }
   0xc   : > { %p349_p9 = pnand %p4334_p7, %p348_p8 }
   0xd   : > { %p391_p10 = scmp.lt.s32.totalorder (!%p349_p9), %s5463_s21, 1  ;;  %v5195_v0 = vld [vmem:[%s6309_s2] sm:$0xff] (!%p349_p9)   ;;  %v5377_v1 = vmov (!%p349_p9), 0   ;;  %v5378_v2 = vmov (!%p349_p9), 0.0   ;;  %v5196_v3 = vld [vmem:[%s6309_s2 + $0x8] sm:$0xff] (!%p349_p9)   ;;  %v5197_v5 = vld [vmem:[%s6309_s2 + $0x10] sm:$0xff] (!%p349_p9)   ;;  %v401_v12 = vlaneseq (!%p349_p9) }
   0xe   : > { %352 = sbr.rel (%p349_p9) target bundleno = 5152 (0x1420), region = 64  ;;  %5194 = vset.pattern.permute.xlu0 (!%p349_p9), %v5377_v1  ;;  %4747 = vmatprep.subr.bf16.mxu0 (!%p349_p9), %v5378_v2  ;;  %vm5379_vm0 = vmmov (!%p349_p9), 0   ;;  %v5198_v6 = vld [vmem:[%s6309_s2 + $0x18] sm:$0xff] (!%p349_p9)   ;;  %v5204_v7 = vld [vmem:[%s6310_s3 + $0x10] sm:$0xff] (!%p349_p9)   ;;  %v5199_v8 = vld [vmem:[%s6309_s2 + $0x20] sm:$0xff] (!%p349_p9)   ;;  %vm660_vm3 = vcmask (!%p349_p9), 261120  }
   0xf   : > { %4748 = vmatpush3.bf16.msra.mxu0 (!%p349_p9), %v5195_v0  ;;  %4775 = vmatprep.subr.bf16.mxu1 (!%p349_p9), %v5378_v2  ;;  %v5200_v9 = vld [vmem:[%s6309_s2 + $0x28] sm:$0xff] (!%p349_p9)   ;;  %v5201_v10 = vld [vmem:[%s6309_s2 + $0x30] sm:$0xff] (!%p349_p9)   ;;  %v5202_v11 = vld [vmem:[%s6309_s2 + $0x38] sm:$0xff] (!%p349_p9)   ;;  %v402_v13 = vand.u32 (!%p349_p9), 127, %v401_v12  ;;  %v5380_v16 = vmov (!%p349_p9), 1.0|1.0  }
  0x10   : > { %4749 = vmatprep.subr.bf16.mxu0 (!%p349_p9), %v5378_v2  ;;  %4763 = vmatprep.mubr.msk.bf16.mxu0 (!%p349_p9), %vm5379_vm0, %v5378_v2  ;;  %v5203_v15 = vld [vmem:[%s6310_s3] sm:$0xff] (!%p349_p9)   ;;  %v5205_v17 = vld [vmem:[%s6310_s3 + $0x8] sm:$0xff] (!%p349_p9)   ;;  %v5206_v18 = vld [vmem:[%s6310_s3 + $0x18] sm:$0xff] (!%p349_p9)   ;;  %vm1276_vm4 = vcmask (!%p349_p9), 64512   ;;  %vm1928_vm5 = vcmask (!%p349_p9), 1043456  }
  0x11   : > { %4779 = vmatprep.mubr.msk.bf16.mxu1 (!%p349_p9), %vm5379_vm0, %v5378_v2  ;;  %4776 = vmatpush3.bf16.msra.mxu1 (!%p349_p9), %v5204_v7  ;;  %v5207_v24 = vld [vmem:[%s6310_s3 + $0x20] sm:$0xff] (!%p349_p9)   ;;  %v5209_v28 = vld [vmem:[%s6310_s3 + $0x28] sm:$0xff] (!%p349_p9)   ;;  %v5211_v30 = vld [vmem:[%s6310_s3 + $0x30] sm:$0xff] (!%p349_p9)  }
  0x12   : > { %4777 = vmatprep.subr.bf16.mxu1 (!%p349_p9), %v5378_v2  ;;  %v5208_v25 = vld [vmem:[%s6310_s3 + $0x40] sm:$0xff] (!%p349_p9)   ;;  %v5210_v29 = vld [vmem:[%s6310_s3 + $0x48] sm:$0xff] (!%p349_p9)   ;;  %v5213_v32 = vld [vmem:[%s6310_s3 + $0x38] sm:$0xff] (!%p349_p9)  }
  0x13   : > { %4750 = vmatpush3.bf16.msra.mxu0 (!%p349_p9), %v5196_v3  ;;  %v5212_v31 = vld [vmem:[%s6310_s3 + $0x60] sm:$0xff] (!%p349_p9)   ;;  %v5214_v33 = vld [vmem:[%s6310_s3 + $0x68] sm:$0xff] (!%p349_p9)   ;;  %v5215_v34 = vld [vmem:[%s6310_s3 + $0x50] sm:$0xff] (!%p349_p9)  }
  0x14   : > { %4751 = vmatprep.subr.bf16.mxu0 (!%p349_p9), %v5378_v2  ;;  %v5216_v35 = vld [vmem:[%s6310_s3 + $0x80] sm:$0xff] (!%p349_p9)   ;;  %v5217_v36 = vld [vmem:[%s6310_s3 + $0x58] sm:$0xff] (!%p349_p9)   ;;  %v5218_v37 = vld [vmem:[%s6310_s3 + $0x88] sm:$0xff] (!%p349_p9)  }
  0x15   : > { %s5496_s12 = scalar_select %p391_p10, %s5463_s21, 1  ;;  %4778 = vmatpush3.bf16.msra.mxu1 %v5206_v18  ;;  %v5219_v38 = vld [vmem:[%s6310_s3 + $0x70] sm:$0xff]   ;;  %v5220_v39 = vld [vmem:[%s6310_s3 + $0xa0] sm:$0xff]   ;;  %v5221_v40 = vld [vmem:[%s6310_s3 + $0x78] sm:$0xff]  }
  0x16   : > { %4783 = vmatprep.subr.bf16.mxu1 %v5378_v2  ;;  %v5222_v41 = vld [vmem:[%s6310_s3 + $0xa8] sm:$0xff]   ;;  %v5223_v42 = vld [vmem:[%s6310_s3 + $0x90] sm:$0xff]   ;;  %v5224_v43 = vld [vmem:[%s6310_s3 + $0x98] sm:$0xff]  }
  0x17   : > { %s4336_s15 = sshll.u32 %s5496_s12, 3  ;;  %4752 = vmatpush3.bf16.msra.mxu0 %v5197_v5  ;;  %v5225_v44 = vld [vmem:[%s6310_s3 + $0xb0] sm:$0xff]   ;;  %v5226_v45 = vld [vmem:[%s6310_s3 + $0xb8] sm:$0xff]   ;;  %v4352_v54 = vld [vmem:[%s6311_s4 + $0x4] ss:$0 sm:$0xff]  ;;  %s4588_s12 = sshll.u32 %s5463_s21, 7 }
  0x18   : > { %s394_s24 = scalar_lea.vmem %s6307_s0, %s4336_s15  ;;  %4753 = vmatprep.subr.bf16.mxu0 %v5378_v2  ;;  %s398_s22 = scalar_lea.vmem %s6308_s1, %s4336_s15  ;;  %v4348_v57 = vld [vmem:[%s6311_s4] ss:$0 sm:$0xff]  ;;  %v4354_v3 = vld [vmem:[%s6311_s4 + $0x6] ss:$0 sm:$0xff] }
  0x19   : > { %v400_v4 = vld [vmem:[%s394_s24] sm:$0xff]  ;;  %s388_s24 = sand.u32 1, %s5367_s18  }
  0x1a   : > { %404 = vperm.xlu0 %5194, %v400_v4   ;;  %v425_v19 = vld [vmem:[%s398_s22] sm:$0xff]  ;;  %s4335_s25 = sshll.u32 %s388_s24, 3  ;;  %s6265_s22 = scalar_lea.hbm %s6318_s11, %s4588_s12 }
  0x1b   : > { %4754 = vmatpush3.bf16.msra.mxu0 %v5198_v6  ;;  %v4350_v6 = vld [vmem:[%s6311_s4 + $0x2] ss:$0 sm:$0xff]  ;;  %s390_s15 = scalar_lea.vmem [#allocation2], %s4335_s25  ;;  %s4247_s29 = scalar_lea.sflag [#allocation3], %s388_s24 }
  0x1c   : > { %4755 = vmatprep.subr.bf16.mxu0 %v5378_v2  ;;  %s4260_s13 = sshll.u32 %s390_s15, 4  ;;  %s5381_s25 = smov [#allocation2]   ;;  %s6267_s13 = int_to_ptr.vmem [resolvable:$true] %s4260_s13 }
  0x1d   : > { %s5313_s21 = scalar_lea.vmem %s6267_s13, 128  ;;  %s5317_s30 = sshll.u32 %s5381_s25, 4  ;;  %s5318_s30 = int_to_ptr.vmem [resolvable:$false] %s5317_s30 }
  0x1e   : > { %p5314_p11 = scmp.ne.s32.totalorder %s6267_s13, %s5313_s21  ;;  %s5319_s14 = scalar_lea.vmem %s5318_s30, 256 }
  0x1f   : > { %4756 = vmatpush3.bf16.msra.mxu0 %v5199_v8  ;;  %p5320_p0 = scmp.lt.s32.totalorder %s6267_s13, %s5318_s30  ;;  %p5321_p1 = scmp.lt.s32.totalorder %s5319_s14, %s5313_s21 }
  0x20   : > { %4757 = vmatprep.subr.bf16.mxu0 %v5378_v2  ;;  %p5315_p12 = pnand %p5314_p11, %p5480_p5 }
  0x21   : > { %p5322_p2 = por %p5321_p1, %p5320_p0 }
  0x22   : > { %p5316_p13 = pneg %p5315_p12 }
  0x23   : > { %4758 = vmatpush3.bf16.msra.mxu0 %v5200_v9 }
  0x24   : > { %4759 = vmatprep.subr.bf16.mxu0 %v5378_v2  ;;  %p5323_p3 = pnand %p5322_p2, %p5316_p13 }
  0x27   : > { %4760 = vmatpush3.bf16.msra.mxu0 %v5201_v10 }
  0x28   : > { %4761 = vmatprep.subr.bf16.mxu0 %v5378_v2 }
  0x2b   : > { %4762 = vmatpush3.bf16.msra.mxu0 %v5202_v11 }
  0x2c   : > { %4767 = vmatprep.subr.bf16.mxu0 %v5378_v2 }
  0x99   : > { %v405_v14 = vpop.permute.xlu0 %404 }
  0x9a   : > { %vm406_vm1 = vcmp.eq.s32.totalorder %v402_v13, %v405_v14 }
  0x9b   : > { %vm4346_vm2 = vmpackc.low %vm406_vm1, %vm406_vm1 }
  0x9c   : > { %4764 = vmatmul.mubr.msk.bf16.vlgmr.msra.gmra.mrb[0].mxu0 %vm4346_vm2, %v5380_v16  ;;  %v4353_v16 = vld [vmem:[%s6311_s4 + $0x5] ss:$0 sm:$0xff] }
  0x9d   : > { %4768 = vmatpush3.bf16.msra.mxu0 %v5203_v15  ;;  %4771 = vmatprep.mubr.msk.bf16.mxu0 %vm5379_vm0, %v5378_v2 }
  0x9e   : > { %4769 = vmatprep.subr.bf16.mxu0 %v5378_v2 }
  0xa1   : > { %4770 = vmatpush3.bf16.msra.mxu0 %v5205_v17  ;;  %v4356_v17 = vld [vmem:[%s6311_s4 + $0x8] ss:$0 sm:$0xff] }
  0xa2   : > { %4799 = vmatprep.subr.bf16.mxu0 %v5378_v2 }
 0x16f   : > { %v508_v20 = vpop.f32.mrb[0].mxu0 }
 0x170   : > { %v5562_v21 = vadd.f32 %v508_v20, %v425_v19  ;;  %v4765_v22 = vpop.f32.mrb[1].mxu0  ;;  %v4349_v20 = vld [vmem:[%s6311_s4 + $0x1] ss:$0 sm:$0xff] }
 0x171   : > { %v511_v23 = vpop.f32.mrb[2].mxu0 }
 0x172   : > { %v5572_v26 = vpack.c.bf16 %v5562_v21, %v5562_v21  ;;  %v4766_v27 = vpop.f32.mrb[3].mxu0 }
 0x174   : > { %4772 = vmatmul.mubr.msk.bf16.vlgmr.msra.gmra.mrb[4].mxu0 %vm660_vm3, %v5572_v26  ;;  %4780 = vmatmul.mubr.msk.bf16.vlgmr.msra.gmra.mrb[0].mxu1 %vm660_vm3, %v5572_v26 }
 0x175   : > { %4784 = vmatpush3.bf16.msra.mxu1 %v5207_v24  ;;  %4800 = vmatpush3.bf16.msra.mxu0 %v5208_v25 }
 0x176   : > { %4785 = vmatprep.subr.bf16.mxu1 %v5378_v2  ;;  %4801 = vmatprep.subr.bf16.mxu0 %v5378_v2 }
 0x177   : > { %4787 = vmatprep.mubr.msk.bf16.mxu1 %vm5379_vm0, %v5378_v2  ;;  %4803 = vmatprep.mubr.msk.bf16.mxu0 %vm5379_vm0, %v5378_v2 }
 0x179   : > { %4786 = vmatpush3.bf16.msra.mxu1 %v5209_v28  ;;  %4802 = vmatpush3.bf16.msra.mxu0 %v5210_v29 }
 0x17a   : > { %4791 = vmatprep.subr.bf16.mxu1 %v5378_v2  ;;  %4815 = vmatprep.subr.bf16.mxu0 %v5378_v2 }
 0x17c   : > { %4788 = vmatmul.mubr.msk.bf16.vlgmr.msra.gmra.mrb[4].mxu1 %vm660_vm3, %v5572_v26  ;;  %4804 = vmatmul.mubr.msk.bf16.vlgmr.msra.gmra.mrb[8].mxu0 %vm660_vm3, %v5572_v26 }
 0x17d   : > { %4792 = vmatpush3.bf16.msra.mxu1 %v5211_v30  ;;  %4816 = vmatpush3.bf16.msra.mxu0 %v5212_v31  ;;  %v4355_v31 = vld [vmem:[%s6311_s4 + $0x7] ss:$0 sm:$0xff] }
 0x17e   : > { %4793 = vmatprep.subr.bf16.mxu1 %v5378_v2  ;;  %4817 = vmatprep.subr.bf16.mxu0 %v5378_v2 }
 0x17f   : > { %4795 = vmatprep.mubr.msk.bf16.mxu1 %vm5379_vm0, %v5378_v2  ;;  %4819 = vmatprep.mubr.msk.bf16.mxu0 %vm5379_vm0, %v5378_v2 }
 0x181   : > { %4794 = vmatpush3.bf16.msra.mxu1 %v5213_v32  ;;  %4818 = vmatpush3.bf16.msra.mxu0 %v5214_v33 }
 0x182   : > { %4807 = vmatprep.subr.bf16.mxu1 %v5378_v2  ;;  %4831 = vmatprep.subr.bf16.mxu0 %v5378_v2 }
 0x184   : > { %4796 = vmatmul.mubr.msk.bf16.vlgmr.msra.gmra.mrb[8].mxu1 %vm660_vm3, %v5572_v26  ;;  %4820 = vmatmul.mubr.msk.bf16.vlgmr.msra.gmra.mrb[12].mxu0 %vm660_vm3, %v5572_v26 }
 0x185   : > { %4808 = vmatpush3.bf16.msra.mxu1 %v5215_v34  ;;  %4832 = vmatpush3.bf16.msra.mxu0 %v5216_v35  ;;  %v4351_v34 = vld [vmem:[%s6311_s4 + $0x3] ss:$0 sm:$0xff] }
 0x186   : > { %4809 = vmatprep.subr.bf16.mxu1 %v5378_v2  ;;  %4833 = vmatprep.subr.bf16.mxu0 %v5378_v2 }
 0x187   : > { %4811 = vmatprep.mubr.msk.bf16.mxu1 %vm5379_vm0, %v5378_v2  ;;  %4835 = vmatprep.mubr.msk.bf16.mxu0 %vm5379_vm0, %v5378_v2 }
 0x189   : > { %4810 = vmatpush3.bf16.msra.mxu1 %v5217_v36  ;;  %4834 = vmatpush3.bf16.msra.mxu0 %v5218_v37 }
 0x18a   : > { %4823 = vmatprep.subr.bf16.mxu1 %v5378_v2  ;;  %4847 = vmatprep.subr.bf16.mxu0 %v5378_v2 }
 0x18c   : > { %4812 = vmatmul.mubr.msk.bf16.vlgmr.msra.gmra.mrb[12].mxu1 %vm660_vm3, %v5572_v26  ;;  %4836 = vmatmul.mubr.msk.bf16.vlgmr.msra.gmra.mrb[16].mxu0 %vm660_vm3, %v5572_v26 }
 0x18d   : > { %4824 = vmatpush3.bf16.msra.mxu1 %v5219_v38  ;;  %4848 = vmatpush3.bf16.msra.mxu0 %v5220_v39 }
 0x18e   : > { %4825 = vmatprep.subr.bf16.mxu1 %v5378_v2  ;;  %4849 = vmatprep.subr.bf16.mxu0 %v5378_v2 }
 0x18f   : > { %4827 = vmatprep.mubr.msk.bf16.mxu1 %vm5379_vm0, %v5378_v2  ;;  %4851 = vmatprep.mubr.msk.bf16.mxu0 %vm5379_vm0, %v5378_v2 }
 0x191   : > { %4826 = vmatpush3.bf16.msra.mxu1 %v5221_v40  ;;  %4850 = vmatpush3.bf16.msra.mxu0 %v5222_v41 }
 0x192   : > { %4839 = vmatprep.subr.bf16.mxu1 %v5378_v2  ;;  %4863 = vmatprep.subr.mxu0 %v5378_v2 }
 0x194   : > { %4828 = vmatmul.mubr.msk.bf16.vlgmr.msra.gmra.mrb[16].mxu1 %vm660_vm3, %v5572_v26  ;;  %4852 = vmatmul.mubr.msk.bf16.vlgmr.msra.gmra.mrb[20].mxu0 %vm660_vm3, %v5572_v26 }
 0x195   : > { %4840 = vmatpush3.bf16.msra.mxu1 %v5223_v42  ;;  %4843 = vmatprep.mubr.msk.bf16.mxu1 %vm5379_vm0, %v5378_v2 }
 0x196   : > { %4841 = vmatprep.subr.bf16.mxu1 %v5378_v2  ;;  %4865 = vmatprep.mubr.msk.f32.mxu0 %vm5379_vm0, %v5378_v2 }
 0x199   : > { %4842 = vmatpush3.bf16.msra.mxu1 %v5224_v43  ;;  %v4357_v43 = vld [vmem:[%s6311_s4 + $0x9] ss:$0 sm:$0xff] }
 0x19a   : > { %4855 = vmatprep.subr.bf16.mxu1 %v5378_v2 }
 0x19c   : > { %4844 = vmatmul.mubr.msk.bf16.vlgmr.msra.gmra.mrb[20].mxu1 %vm660_vm3, %v5572_v26 }
 0x19d   : > { %4856 = vmatpush3.bf16.msra.mxu1 %v5225_v44  ;;  %4859 = vmatprep.mubr.msk.bf16.mxu1 %vm5379_vm0, %v5378_v2 }
 0x19e   : > { %4857 = vmatprep.subr.bf16.mxu1 %v5378_v2 }
 0x1a1   : > { %4858 = vmatpush3.bf16.msra.mxu1 %v5226_v45 }
 0x1a2   : > { %4868 = vmatprep.subr.mxu1 %v5378_v2 }
 0x1a4   : > { %4860 = vmatmul.mubr.msk.bf16.vlgmr.msra.gmra.mrb[24].mxu1 %vm660_vm3, %v5572_v26 }
 0x1a5   : > { %4870 = vmatprep.mubr.msk.f32.mxu1 %vm5379_vm0, %v5378_v2 }
 0x247   : > { %v698_v46 = vpop.f32.mrb[4].mxu0  ;;  %v750_v47 = vpop.f32.mrb[0].mxu1 }
 0x248   : > { %v4773_v48 = vpop.f32.mrb[5].mxu0  ;;  %v4781_v49 = vpop.f32.mrb[1].mxu1  ;;  %v699_v1 = vadd.f32 %v4348_v57, %v698_v46  ;;  %v751_v30 = vadd.f32 %v4349_v20, %v750_v47 }
 0x249   : > { %v701_v50 = vpop.f32.mrb[6].mxu0  ;;  %v753_v51 = vpop.f32.mrb[2].mxu1 }
 0x24a   : > { %v4774_v52 = vpop.f32.mrb[7].mxu0  ;;  %v4782_v53 = vpop.f32.mrb[3].mxu1 }
 0x24f   : > { %v802_v55 = vpop.f32.mrb[4].mxu1  ;;  %v906_v56 = vpop.f32.mrb[8].mxu0 }
 0x250   : > { %v907_v58 = vadd.f32 %v4352_v54, %v906_v56  ;;  %v4789_v59 = vpop.f32.mrb[5].mxu1  ;;  %v4805_v60 = vpop.f32.mrb[9].mxu0  ;;  %v803_v15 = vadd.f32 %v4350_v6, %v802_v55 }
 0x251   : > { %v805_v61 = vpop.f32.mrb[6].mxu1  ;;  %v909_v62 = vpop.f32.mrb[10].mxu0 }
 0x252   : > { %v4790_v63 = vpop.f32.mrb[7].mxu1  ;;  %v4806_v0 = vpop.f32.mrb[11].mxu0  ;;  %4864 = vmatpush3.xpose.msk.msra.mxu0 %vm1276_vm4, %v907_v58 }
 0x253   : > { %4873 = vmatprep.subr.mxu0 %v5378_v2 }
 0x255   : > { %4866 = vmatmul.mubr.msk.f32.vlgmr.msra.gmra.mrb[24].mxu0 %vm1276_vm4, %v699_v1 }
 0x256   : > { %4875 = vmatprep.mubr.msk.f32.mxu0 %vm5379_vm0, %v5378_v2 }
 0x257   : > { %v854_v4 = vpop.f32.mrb[8].mxu1  ;;  %v1010_v5 = vpop.f32.mrb[12].mxu0 }
 0x258   : > { %v1011_v7 = vadd.f32 %v4354_v3, %v1010_v5  ;;  %v4797_v8 = vpop.f32.mrb[9].mxu1  ;;  %v4821_v9 = vpop.f32.mrb[13].mxu0  ;;  %v855_v42 = vadd.f32 %v4351_v34, %v854_v4 }
 0x259   : > { %v857_v10 = vpop.f32.mrb[10].mxu1  ;;  %v1013_v11 = vpop.f32.mrb[14].mxu0 }
 0x25a   : > { %v4798_v13 = vpop.f32.mrb[11].mxu1  ;;  %v4822_v14 = vpop.f32.mrb[15].mxu0  ;;  %4874 = vmatpush3.xpose.msk.msra.mxu0 %vm1276_vm4, %v1011_v7 }
 0x25b   : > { %4883 = vmatprep.subr.mxu0 %v5378_v2 }
 0x25d   : > { %4876 = vmatmul.mubr.msk.f32.vlgmr.msra.gmra.mrb[26].mxu0 %vm1276_vm4, %v803_v15 }
 0x25e   : > { %4885 = vmatprep.mubr.msk.f32.mxu0 %vm5379_vm0, %v5378_v2 }
 0x25f   : > { %v958_v18 = vpop.f32.mrb[12].mxu1  ;;  %v1114_v19 = vpop.f32.mrb[16].mxu0 }
 0x260   : > { %v959_v22 = vadd.f32 %v4353_v16, %v958_v18  ;;  %v1115_v23 = vadd.f32 %v4356_v17, %v1114_v19  ;;  %v4813_v24 = vpop.f32.mrb[13].mxu1  ;;  %v4837_v25 = vpop.f32.mrb[17].mxu0 }
 0x261   : > { %v961_v26 = vpop.f32.mrb[14].mxu1  ;;  %v1117_v27 = vpop.f32.mrb[18].mxu0  ;;  %v4358_v25 = vld [vmem:[%s6311_s4 + $0xa] ss:$0 sm:$0xff] }
 0x262   : > { %v4814_v28 = vpop.f32.mrb[15].mxu1  ;;  %v4838_v29 = vpop.f32.mrb[19].mxu0  ;;  %4869 = vmatpush3.xpose.msk.msra.mxu1 %vm1276_vm4, %v959_v22  ;;  %4884 = vmatpush3.msra.mxu0 %v1115_v23 }
 0x263   : > { %4878 = vmatprep.subr.mxu1 %v5378_v2  ;;  %4893 = vmatprep.subr.mxu0 %v5378_v2 }
 0x265   : > { %4871 = vmatmul.mubr.msk.f32.vlgmr.msra.gmra.mrb[28].mxu1 %vm1276_vm4, %v751_v30 }
 0x266   : > { %4880 = vmatprep.mubr.msk.f32.mxu1 %vm5379_vm0, %v5378_v2 }
 0x267   : > { %v1062_v32 = vpop.f32.mrb[16].mxu1  ;;  %v5736_v33 = vpop.f32.mrb[20].mxu0 }
 0x268   : > { %v1063_v35 = vadd.f32 %v4355_v31, %v1062_v32  ;;  %v4829_v36 = vpop.f32.mrb[17].mxu1  ;;  %v4853_v37 = vpop.f32.mrb[21].mxu0  ;;  %v1219_v28 = vadd.f32 %v4358_v25, %v5736_v33  ;;  %v4359_v32 = vld [vmem:[%s6311_s4 + $0xb] ss:$0 sm:$0xff] }
 0x269   : > { %v1065_v38 = vpop.f32.mrb[18].mxu1  ;;  %v1221_v39 = vpop.f32.mrb[22].mxu0 }
 0x26a   : > { %v4830_v40 = vpop.f32.mrb[19].mxu1  ;;  %v4854_v41 = vpop.f32.mrb[23].mxu0  ;;  %4879 = vmatpush3.xpose.msk.msra.mxu1 %vm1276_vm4, %v1063_v35 }
 0x26b   : > { %4888 = vmatprep.subr.mxu1 %v5378_v2  ;;  %v1921_v40 = vld [vmem:[%s6312_s5] sm:$0xf] }
 0x26c   : > { %v1930_v41 = vsel %vm1928_vm5, %v1921_v40, 0 }
 0x26d   : > { %4881 = vmatmul.mubr.msk.f32.vlgmr.msra.gmra.mrb[30].mxu1 %vm1276_vm4, %v855_v42  ;;  %v1922_v42 = vld [vmem:[%s6312_s5 + $0x4] sm:$0xf] }
 0x26e   : > { %4890 = vmatprep.mubr.msk.f32.mxu1 %vm5379_vm0, %v5378_v2 }
 0x26f   : > { %v1166_v44 = vpop.f32.mrb[20].mxu1 }
 0x270   : > { %v1167_v45 = vadd.f32 %v4357_v43, %v1166_v44  ;;  %v4845_v46 = vpop.f32.mrb[21].mxu1  ;;  %v1976_v43 = vsel %vm1928_vm5, %v1922_v42, 0  ;;  %v1923_v44 = vld [vmem:[%s6312_s5 + $0x8] sm:$0xf] }
 0x271   : > { %v1169_v47 = vpop.f32.mrb[22].mxu1 }
 0x272   : > { %v4846_v48 = vpop.f32.mrb[23].mxu1  ;;  %4889 = vmatpush3.msra.mxu1 %v1167_v45 }
 0x273   : > { %4898 = vmatprep.subr.mxu1 %v5378_v2  ;;  %v2022_v48 = vsel %vm1928_vm5, %v1923_v44, 0 }
 0x277   : > { %v5750_v49 = vpop.f32.mrb[24].mxu1 }
 0x278   : > { %v4861_v50 = vpop.f32.mrb[25].mxu1  ;;  %v1271_v35 = vadd.f32 %v4359_v32, %v5750_v49  ;;  %v1924_v49 = vld [vmem:[%s6312_s5 + $0xc] sm:$0xf] }
 0x279   : > { %v1273_v51 = vpop.f32.mrb[26].mxu1 }
 0x27a   : > { %v4862_v52 = vpop.f32.mrb[27].mxu1 }
 0x328   : > { %v1349_v53 = vpop.f32.mrb[24].mxu0 }
 0x329   : > { %v4867_v54 = vpop.f32.mrb[25].mxu0  ;;  %v1581_v55 = vsel %vm1276_vm4, %v1349_v53, -inf }
 0x32a   : > { %1582 = vmax.xlane.f32.xlu0 %v1581_v55 }
 0x330   : > { %v1501_v56 = vpop.f32.mrb[26].mxu0 }
 0x331   : > { %v4877_v57 = vpop.f32.mrb[27].mxu0  ;;  %v1587_v61 = vsel %vm1276_vm4, %v1501_v56, -inf }
 0x338   : > { %v1425_v58 = vpop.f32.mrb[28].mxu1 }
 0x339   : > { %v4872_v59 = vpop.f32.mrb[29].mxu1  ;;  %v1584_v60 = vsel %vm1276_vm4, %v1425_v58, -inf }
 0x33a   : > { %1585 = vmax.xlane.f32.xlu1 %v1584_v60 }
 0x33e   : > { %1588 = vmax.xlane.f32.xlu1 %v1587_v61 }
 0x340   : > { %v1577_v62 = vpop.f32.mrb[30].mxu1 }
 0x341   : > { %v4882_v63 = vpop.f32.mrb[31].mxu1  ;;  %v1590_v0 = vsel %vm1276_vm4, %v1577_v62, -inf }
 0x342   : > { %1591 = vmax.xlane.f32.xlu1 %v1590_v0  ;;  %v5815_v0 = vshrl.u32 %v401_v12, 7  ;;  %v5824_v12 = vld [vmem:[%s6315_s8] sm:$0xff] }
 0x344   : > { %v2144_v44 = vsub.s32 2, %v5815_v0 }
 0x3b7   : > { %v1583_v1 = vpop.xlane.xlu0 %1582 }
 0x3b8   : > { %v1593_v3 = vsub.f32 %v1349_v53, %v1583_v1  ;;  %v2068_v53 = vsel %vm1928_vm5, %v1924_v49, 0 }
 0x3ba   : > { %v1597_v4 = vmul.f32 1.442695, %v1593_v3 }
 0x3bc   : > { %5273 = vpow2.f32 %v1597_v4 }
 0x3c6   : > { %v5274_v5 = vpop.eup %5273 }
 0x3c7   : > { %v1586_v6 = vpop.xlane.xlu1 %1585  ;;  %v1605_v7 = vsel %vm1276_vm4, %v5274_v5, 0.0 }
 0x3c8   : > { %v1594_v8 = vsub.f32 %v1425_v58, %v1586_v6  ;;  %1606 = vadd.xlane.f32.xlu1 %v1605_v7 }
 0x3ca   : > { %v1599_v9 = vmul.f32 1.442695, %v1594_v8 }
 0x3cb   : > { %v1589_v10 = vpop.xlane.xlu1 %1588 }
 0x3cc   : > { %5275 = vpow2.f32 %v1599_v9  ;;  %v1595_v11 = vsub.f32 %v1501_v56, %v1589_v10  ;;  %v2119_v10 = vsub.s32 0, %v5815_v0 }
 0x3ce   : > { %v1601_v13 = vmul.f32 1.442695, %v1595_v11 }
 0x3cf   : > { %v1592_v14 = vpop.xlane.xlu1 %1591 }
 0x3d0   : > { %5277 = vpow2.f32 %v1601_v13  ;;  %v1596_v15 = vsub.f32 %v1577_v62, %v1592_v14 }
 0x3d2   : > { %v1603_v16 = vmul.f32 1.442695, %v1596_v15 }
 0x3d4   : > { %5279 = vpow2.f32 %v1603_v16 }
 0x3d6   : > { %v5276_v17 = vpop.eup %5275 }
 0x3d7   : > { %v1608_v18 = vsel %vm1276_vm4, %v5276_v17, 0.0 }
 0x3d8   : > { %1609 = vadd.xlane.f32.xlu1 %v1608_v18  ;;  %v2120_v18 = vrot.slane %v5824_v12, %v2119_v10 }
 0x3da   : > { %v5278_v19 = vpop.eup %5277 }
 0x3db   : > { %v1611_v20 = vsel %vm1276_vm4, %v5278_v19, 0.0 }
 0x3dc   : > { %1612 = vadd.xlane.f32.xlu1 %v1611_v20 }
 0x3de   : > { %v5280_v22 = vpop.eup %5279 }
 0x3df   : > { %v1614_v23 = vsel %vm1276_vm4, %v5280_v22, 0.0 }
 0x3e0   : > { %1615 = vadd.xlane.f32.xlu1 %v1614_v23 }
 0x455   : > { %v1607_v24 = vpop.xlane.xlu1 %1606 }
 0x456   : > { %5281 = vrcp.f32 %v1607_v24 }
 0x460   : > { %v5282_v26 = vpop.eup %5281 }
 0x461   : > { %v1621_v27 = vmul.f32 %v5282_v26, %v5274_v5 }
 0x463   : > { %4886 = vmatmul.mubr.msk.f32.vlgmr.msra.gmra.mrb[28].mxu0 %vm1276_vm4, %v1621_v27 }
 0x464   : > { %4894 = vmatpush3.msra.mxu0 %v1219_v28  ;;  %4895 = vmatprep.mubr.msk.f32.mxu0 %vm5379_vm0, %v5378_v2 }
 0x465   : > { %v1610_v29 = vpop.xlane.xlu1 %1609  ;;  %4903 = vmatprep.subr.bf16.mxu0 %v5378_v2 }
 0x466   : > { %5283 = vrcp.f32 %v1610_v29 }
 0x469   : > { %v1613_v30 = vpop.xlane.xlu1 %1612 }
 0x46a   : > { %5285 = vrcp.f32 %v1613_v30 }
 0x46d   : > { %v1616_v31 = vpop.xlane.xlu1 %1615 }
 0x46e   : > { %5287 = vrcp.f32 %v1616_v31 }
 0x470   : > { %v5284_v34 = vpop.eup %5283 }
 0x471   : > { %v1622_v33 = vmul.f32 %v5284_v34, %v5276_v17  ;;  %v5227_v34 = vld [vmem:[%s6313_s6] sm:$0xff]  }
 0x473   : > { %4891 = vmatmul.mubr.msk.f32.vlgmr.msra.gmra.mrb[32].mxu1 %vm1276_vm4, %v1622_v33  ;;  %v5228_v33 = vld [vmem:[%s6313_s6 + $0x8] sm:$0xff]  }
 0x474   : > { %v5286_v36 = vpop.eup %5285  ;;  %4899 = vmatpush3.msra.mxu1 %v1271_v35  ;;  %4900 = vmatprep.mubr.msk.f32.mxu1 %vm5379_vm0, %v5378_v2  ;;  %v5230_v35 = vld [vmem:[%s6314_s7 + $0x8] sm:$0xff]  }
 0x475   : > { %v1623_v37 = vmul.f32 %v5286_v36, %v5278_v19  ;;  %4909 = vmatprep.subr.bf16.mxu1 %v5378_v2  ;;  %v5231_v36 = vld [vmem:[%s6314_s7 + $0x10] sm:$0xff]  }
 0x477   : > { %4896 = vmatmul.mubr.msk.f32.vlgmr.msra.gmra.mrb[30].mxu0 %vm1276_vm4, %v1623_v37  ;;  %v5232_v37 = vld [vmem:[%s6314_s7 + $0x18] sm:$0xff]  }
 0x478   : > { %v5288_v38 = vpop.eup %5287  ;;  %4905 = vmatprep.mubr.msk.bf16.mxu0 %vm5379_vm0, %v5378_v2  ;;  %4904 = vmatpush3.bf16.msra.mxu0 %v1930_v41 }
 0x479   : > { %v1624_v39 = vmul.f32 %v5288_v38, %v5280_v22  ;;  %4915 = vmatprep.subr.bf16.mxu0 %v5378_v2  ;;  %v5233_v38 = vld [vmem:[%s6314_s7 + $0x20] sm:$0xff]  }
 0x47b   : > { %4901 = vmatmul.mubr.msk.f32.vlgmr.msra.gmra.mrb[34].mxu1 %vm1276_vm4, %v1624_v39  ;;  %v5234_v39 = vld [vmem:[%s6314_s7 + $0x28] sm:$0xff]  }
 0x47c   : > { %4911 = vmatprep.mubr.msk.bf16.mxu1 %vm5379_vm0, %v5378_v2  ;;  %4910 = vmatpush3.bf16.msra.mxu1 %v1976_v43  ;;  %v2139_v43 = vsub.s32 1, %v5815_v0 }
 0x47d   : > { %4921 = vmatprep.subr.bf16.mxu1 %v5378_v2 }
 0x536   : > { %v1694_v45 = vpop.f32.mrb[28].mxu0 }
 0x537   : > { %v1917_v46 = vpack.c.bf16 %v1694_v45, %v1694_v45  ;;  %v4887_v47 = vpop.f32.mrb[29].mxu0  ;;  %v2140_v45 = vrot.slane %v5824_v12, %v2139_v43 }
 0x539   : > { %4906 = vmatmul.mubr.msk.bf16.vlgmr.msra.gmra.mrb[32].mxu0 %vm1276_vm4, %v1917_v46 }
 0x53a   : > { %4916 = vmatpush3.bf16.msra.mxu0 %v2022_v48  ;;  %4917 = vmatprep.mubr.msk.bf16.mxu0 %vm5379_vm0, %v5378_v2  ;;  %v2145_v48 = vrot.slane %v5824_v12, %v2144_v44 }
 0x53b   : > { %4927 = vmatprep.subr.bf16.mxu0 %v5378_v2 }
 0x546   : > { %v1767_v50 = vpop.f32.mrb[32].mxu1 }
 0x547   : > { %v1918_v51 = vpack.c.bf16 %v1767_v50, %v1767_v50  ;;  %v4892_v52 = vpop.f32.mrb[33].mxu1 }
 0x548   : > { %v5235_v52 = vld [vmem:[%s6314_s7 + $0x30] sm:$0xff]  }
 0x549   : > { %4912 = vmatmul.mubr.msk.bf16.vlgmr.msra.gmra.mrb[36].mxu1 %vm1276_vm4, %v1918_v51 }
 0x54a   : > { %v1840_v54 = vpop.f32.mrb[30].mxu0  ;;  %4922 = vmatpush3.bf16.msra.mxu1 %v2068_v53  ;;  %4923 = vmatprep.mubr.msk.bf16.mxu1 %vm5379_vm0, %v5378_v2  ;;  %v5236_v53 = vld [vmem:[%s6314_s7 + $0x38] sm:$0xff]  }
 0x54b   : > { %v1919_v55 = vpack.c.bf16 %v1840_v54, %v1840_v54  ;;  %v4897_v56 = vpop.f32.mrb[31].mxu0  ;;  %4935 = vmatprep.subr.bf16.mxu1 %v5378_v2  ;;  %v2154_v54 = vsub.s32 3, %v5815_v0 }
 0x54d   : > { %4918 = vmatmul.mubr.msk.bf16.vlgmr.msra.gmra.mrb[36].mxu0 %vm1276_vm4, %v1919_v55  ;;  %v2155_v55 = vrot.slane %v5824_v12, %v2154_v54 }
 0x54e   : > { %v1913_v57 = vpop.f32.mrb[34].mxu1  ;;  %4931 = vmatprep.mubr.msk.bf16.mxu0 %vm5379_vm0, %v5378_v2  ;;  %4928 = vmatpush3.bf16.msra.mxu0 %v5227_v34  ;;  %v5241_v34 = vld [vmem:[%s6310_s3 + $0xd0] sm:$0xff]  }
 0x54f   : > { %v1920_v58 = vpack.c.bf16 %v1913_v57, %v1913_v57  ;;  %v4902_v59 = vpop.f32.mrb[35].mxu1  ;;  %4929 = vmatprep.subr.bf16.mxu0 %v5378_v2 }
 0x551   : > { %4924 = vmatmul.mubr.msk.bf16.vlgmr.msra.gmra.mrb[40].mxu1 %vm1276_vm4, %v1920_v58 }
 0x552   : > { %4951 = vmatprep.mubr.msk.bf16.mxu1 %vm5379_vm0, %v5378_v2  ;;  %4930 = vmatpush3.bf16.msra.mxu0 %v5228_v33  ;;  %v5242_v33 = vld [vmem:[%s6310_s3 + $0x120] sm:$0xff]  }
 0x553   : > { %4955 = vmatprep.subr.bf16.mxu0 %v5378_v2 }
 0x60c   : > { %v1966_v60 = vpop.f32.mrb[32].mxu0 }
 0x60d   : > { %v4907_v61 = vpop.f32.mrb[33].mxu0  ;;  %v2110_v3 = vsel %vm660_vm3, %v1966_v60, 0.0 }
 0x60e   : > { %v1969_v62 = vpop.f32.mrb[34].mxu0 }
 0x60f   : > { %v4908_v63 = vpop.f32.mrb[35].mxu0 }
 0x610   : > { %v2231_v63 = vsub.s32 4, %v5815_v0 }
 0x61c   : > { %v2012_v1 = vpop.f32.mrb[36].mxu1 }
 0x61d   : > { %v2111_v4 = vsel %vm660_vm3, %v2012_v1, 0.0  ;;  %v4913_v5 = vpop.f32.mrb[37].mxu1  ;;  %v2232_v1 = vrot.slane %v5824_v12, %v2231_v63 }
 0x61e   : > { %v2112_v6 = vadd.f32 %v2111_v4, %v2110_v3  ;;  %v2015_v7 = vpop.f32.mrb[38].mxu1 }
 0x61f   : > { %v4914_v8 = vpop.f32.mrb[39].mxu1 }
 0x620   : > { %v2058_v9 = vpop.f32.mrb[36].mxu0 }
 0x621   : > { %v2113_v11 = vsel %vm660_vm3, %v2058_v9, 0.0  ;;  %v4919_v13 = vpop.f32.mrb[37].mxu0 }
 0x622   : > { %v2114_v14 = vadd.f32 %v2113_v11, %v2112_v6  ;;  %v2061_v15 = vpop.f32.mrb[38].mxu0 }
 0x623   : > { %v4920_v16 = vpop.f32.mrb[39].mxu0 }
 0x624   : > { %v2104_v17 = vpop.f32.mrb[40].mxu1 }
 0x625   : > { %v2115_v19 = vsel %vm660_vm3, %v2104_v17, 0.0  ;;  %v4925_v20 = vpop.f32.mrb[41].mxu1  ;;  %v5237_v17 = vld [vmem:[%s6310_s3 + $0xc0] sm:$0xff]  }
 0x626   : > { %v2116_v22 = vadd.f32 %v2115_v19, %v2114_v14  ;;  %v2107_v23 = vpop.f32.mrb[42].mxu1  ;;  %v5239_v19 = vld [vmem:[%s6310_s3 + $0xc8] sm:$0xff]  }
 0x627   : > { %v4926_v24 = vpop.f32.mrb[43].mxu1  ;;  %v5240_v20 = vld [vmem:[%s6310_s3 + $0x108] sm:$0xff]  }
 0x628   : > { %v2121_v25 = vadd.f32 %v2120_v18, %v2116_v22  ;;  %v5238_v18 = vld [vmem:[%s6310_s3 + $0x100] sm:$0xff]  }
 0x62a   : > { %v2122_v26 = vadd.f32 %v2121_v25, %v5562_v21  ;;  %v5229_v21 = vld [vmem:[%s6314_s7] sm:$0xff]   ;;  %v2337_v25 = vsub.s32 5, %v5815_v0 }
 0x62b   : > { %4936 = vmatpush3.bf16.msra.mxu1 %v5229_v21 }
 0x62c   : > { %v2123_v27 = vsel %vm660_vm3, %v2122_v26, 0.0  ;;  %4937 = vmatprep.subr.bf16.mxu1 %v5378_v2 }
 0x62d   : > { %2124 = vadd.xlane.f32.xlu1 %v2123_v27  ;;  %v2338_v27 = vrot.slane %v5824_v12, %v2337_v25 }
 0x62f   : > { %4938 = vmatpush3.bf16.msra.mxu1 %v5230_v35  ;;  %v5244_v35 = vld [vmem:[%s6310_s3 + $0x128] sm:$0xff]  }
 0x630   : > { %4939 = vmatprep.subr.bf16.mxu1 %v5378_v2 }
 0x633   : > { %4940 = vmatpush3.bf16.msra.mxu1 %v5231_v36  ;;  %v5245_v36 = vld [vmem:[%s6310_s3 + $0xe0] sm:$0xff]  }
 0x634   : > { %4941 = vmatprep.subr.bf16.mxu1 %v5378_v2 }
 0x637   : > { %4942 = vmatpush3.bf16.msra.mxu1 %v5232_v37  ;;  %v5246_v37 = vld [vmem:[%s6310_s3 + $0x140] sm:$0xff]  }
 0x638   : > { %4943 = vmatprep.subr.bf16.mxu1 %v5378_v2 }
 0x63b   : > { %4944 = vmatpush3.bf16.msra.mxu1 %v5233_v38  ;;  %v5247_v38 = vld [vmem:[%s6310_s3 + $0xe8] sm:$0xff]  }
 0x63c   : > { %4945 = vmatprep.subr.bf16.mxu1 %v5378_v2 }
 0x63f   : > { %4946 = vmatpush3.bf16.msra.mxu1 %v5234_v39  ;;  %v5248_v39 = vld [vmem:[%s6310_s3 + $0x148] sm:$0xff]  }
 0x640   : > { %4947 = vmatprep.subr.bf16.mxu1 %v5378_v2 }
 0x643   : > { %4948 = vmatpush3.bf16.msra.mxu1 %v5235_v52  ;;  %v5259_v52 = vld [vmem:[%s6310_s3 + $0x170] sm:$0xff]  }
 0x644   : > { %4949 = vmatprep.subr.bf16.mxu1 %v5378_v2 }
 0x647   : > { %4950 = vmatpush3.bf16.msra.mxu1 %v5236_v53  ;;  %v5260_v53 = vld [vmem:[%s6310_s3 + $0x178] sm:$0xff]  }
 0x648   : > { %4987 = vmatprep.subr.bf16.mxu1 %v5378_v2 }
 0x6ba   : > { %v2125_v28 = vpop.xlane.xlu1 %2124 }
 0x6bb   : > { %v2127_v29 = vmul.f32 0.03125, %v2125_v28 }
 0x6bd   : > { %v2128_v30 = vsub.f32 %v2122_v26, %v2127_v29  ;;  %v2342_v26 = vsub.s32 6, %v5815_v0 }
 0x6bf   : > { %v2129_v31 = vmul.f32 %v2128_v30, %v2128_v30  ;;  %v2343_v29 = vrot.slane %v5824_v12, %v2342_v26  ;;  %v5243_v12 = vld [vmem:[%s6310_s3 + $0xd8] sm:$0xff]  }
 0x6c1   : > { %v2130_v32 = vsel %vm660_vm3, %v2129_v31, 0.0 }
 0x6c2   : > { %2131 = vadd.xlane.f32.xlu1 %v2130_v32 }
 0x74f   : > { %v2132_v40 = vpop.xlane.xlu1 %2131 }
 0x750   : > { %v2133_v41 = vmul.f32 0.03125, %v2132_v40  ;;  %v5249_v40 = vld [vmem:[%s6310_s3 + $0xf0] sm:$0xff]  }
 0x752   : > { %v2134_v42 = vadd.f32 1e-05, %v2133_v41  ;;  %v5250_v41 = vld [vmem:[%s6310_s3 + $0x160] sm:$0xff]  }
 0x754   : > { %5289 = vrsqrt.f32 %v2134_v42  ;;  %v5251_v42 = vld [vmem:[%s6310_s3 + $0xf8] sm:$0xff]  }
 0x75e   : > { %v5290_v46 = vpop.eup %5289 }
 0x75f   : > { %v2136_v47 = vmul.f32 %v5290_v46, %v2128_v30  ;;  %v5253_v46 = vld [vmem:[%s6310_s3 + $0x110] sm:$0xff]  }
 0x761   : > { %v2141_v49 = vmul.f32 %v2140_v45, %v2136_v47  ;;  %v5252_v45 = vld [vmem:[%s6310_s3 + $0x168] sm:$0xff]   ;;  %v5254_v47 = vld [vmem:[%s6310_s3 + $0x118] sm:$0xff]  }
 0x763   : > { %v2146_v50 = vadd.f32 %v2145_v48, %v2141_v49  ;;  %v5255_v48 = vld [vmem:[%s6310_s3 + $0x130] sm:$0xff]   ;;  %v5256_v49 = vld [vmem:[%s6310_s3 + $0x138] sm:$0xff]  }
 0x765   : > { %v2147_v51 = vpack.c.bf16 %v2146_v50, %v2146_v50 }
 0x767   : > { %4932 = vmatmul.mubr.msk.bf16.vlgmr.msra.gmra.mrb[40].mxu0 %vm660_vm3, %v2147_v51  ;;  %v5258_v51 = vld [vmem:[%s6310_s3 + $0x158] sm:$0xff]  }
 0x768   : > { %4959 = vmatprep.mubr.msk.bf16.mxu0 %vm5379_vm0, %v5378_v2  ;;  %4956 = vmatpush3.bf16.msra.mxu0 %v5237_v17 }
 0x769   : > { %4957 = vmatprep.subr.bf16.mxu0 %v5378_v2 }
 0x76c   : > { %4958 = vmatpush3.bf16.msra.mxu0 %v5239_v19  ;;  %v4492_v19 = vld [vmem:[%s6311_s4 + $0x14] ss:$0 sm:$0xff] }
 0x76d   : > { %4963 = vmatprep.subr.bf16.mxu0 %v5378_v2 }
 0x83a   : > { %v2205_v56 = vpop.f32.mrb[40].mxu0 }
 0x83b   : > { %v2206_v57 = vadd.f32 %v2205_v56, %v2155_v55  ;;  %v4933_v58 = vpop.f32.mrb[41].mxu0  ;;  %v4488_v55 = vld [vmem:[%s6311_s4 + $0x10] ss:$0 sm:$0xff] }
 0x83c   : > { %v2208_v59 = vpop.f32.mrb[42].mxu0  ;;  %v4484_v58 = vld [vmem:[%s6311_s4 + $0xc] ss:$0 sm:$0xff] }
 0x83d   : > { %v2211_v60 = vmax.f32 %v2206_v57, 0.0  ;;  %v4934_v61 = vpop.f32.mrb[43].mxu0 }
 0x83f   : > { %v2212_v62 = vpack.c.bf16 %v2211_v60, %v2211_v60 }
 0x841   : > { %4952 = vmatmul.mubr.bf16.vlgmr.msra.gmra.mrb[44].mxu1 %v2212_v62 }
 0x842   : > { %4991 = vmatprep.mubr.msk.bf16.mxu1 %vm5379_vm0, %v5378_v2  ;;  %4988 = vmatpush3.bf16.msra.mxu1 %v5238_v18  ;;  %v4486_v18 = vld [vmem:[%s6311_s4 + $0xe] ss:$0 sm:$0xff] }
 0x843   : > { %4989 = vmatprep.subr.bf16.mxu1 %v5378_v2 }
 0x846   : > { %4990 = vmatpush3.bf16.msra.mxu1 %v5240_v20 }
 0x847   : > { %5003 = vmatprep.subr.bf16.mxu1 %v5378_v2 }
 0x914   : > { %v2315_v3 = vpop.f32.mrb[44].mxu1 }
 0x915   : > { %v2316_v4 = vadd.f32 %v2315_v3, %v2232_v1  ;;  %v4953_v5 = vpop.f32.mrb[45].mxu1 }
 0x916   : > { %v2318_v6 = vpop.f32.mrb[46].mxu1 }
 0x917   : > { %v4954_v7 = vpop.f32.mrb[47].mxu1  ;;  %v2321_v8 = vadd.f32 %v2316_v4, %v2146_v50  ;;  %v5257_v50 = vld [vmem:[%s6310_s3 + $0x150] sm:$0xff]  }
 0x918   : > { %v4490_v6 = vld [vmem:[%s6311_s4 + $0x12] ss:$0 sm:$0xff] }
 0x919   : > { %v2322_v9 = vsel %vm660_vm3, %v2321_v8, 0.0 }
 0x91a   : > { %2323 = vadd.xlane.f32.xlu0 %v2322_v9 }
 0x9a7   : > { %v2324_v11 = vpop.xlane.xlu0 %2323 }
 0x9a8   : > { %v2325_v13 = vmul.f32 0.03125, %v2324_v11 }
 0x9aa   : > { %v2326_v14 = vsub.f32 %v2321_v8, %v2325_v13 }
 0x9ac   : > { %v2327_v15 = vmul.f32 %v2326_v14, %v2326_v14 }
 0x9ae   : > { %v2328_v16 = vsel %vm660_vm3, %v2327_v15, 0.0 }
 0x9af   : > { %2329 = vadd.xlane.f32.xlu1 %v2328_v16 }
 0xa3c   : > { %v2330_v22 = vpop.xlane.xlu1 %2329 }
 0xa3d   : > { %v2331_v23 = vmul.f32 0.03125, %v2330_v22 }
 0xa3f   : > { %v2332_v24 = vadd.f32 1e-05, %v2331_v23 }
 0xa41   : > { %5291 = vrsqrt.f32 %v2332_v24 }
 0xa4b   : > { %v5292_v28 = vpop.eup %5291 }
 0xa4c   : > { %v2334_v30 = vmul.f32 %v5292_v28, %v2326_v14 }
 0xa4e   : > { %v2339_v31 = vmul.f32 %v2338_v27, %v2334_v30 }
 0xa50   : > { %v5920_v32 = vadd.f32 %v2343_v29, %v2339_v31 }
 0xa52   : > { %v5930_v21 = vpack.c.bf16 %v5920_v32, %v5920_v32 }
 0xa54   : > { %4960 = vmatmul.mubr.msk.bf16.vlgmr.msra.gmra.mrb[44].mxu0 %vm660_vm3, %v5930_v21  ;;  %4992 = vmatmul.mubr.msk.bf16.vlgmr.msra.gmra.mrb[48].mxu1 %vm660_vm3, %v5930_v21 }
 0xa55   : > { %4964 = vmatpush3.bf16.msra.mxu0 %v5241_v34  ;;  %5004 = vmatpush3.bf16.msra.mxu1 %v5242_v33 }
 0xa56   : > { %4965 = vmatprep.subr.bf16.mxu0 %v5378_v2  ;;  %5005 = vmatprep.subr.bf16.mxu1 %v5378_v2 }
 0xa57   : > { %4967 = vmatprep.mubr.msk.bf16.mxu0 %vm5379_vm0, %v5378_v2  ;;  %5007 = vmatprep.mubr.msk.bf16.mxu1 %vm5379_vm0, %v5378_v2 }
 0xa59   : > { %4966 = vmatpush3.bf16.msra.mxu0 %v5243_v12  ;;  %5006 = vmatpush3.bf16.msra.mxu1 %v5244_v35 }
 0xa5a   : > { %4971 = vmatprep.subr.bf16.mxu0 %v5378_v2  ;;  %5019 = vmatprep.subr.bf16.mxu1 %v5378_v2 }
 0xa5c   : > { %4968 = vmatmul.mubr.msk.bf16.vlgmr.msra.gmra.mrb[48].mxu0 %vm660_vm3, %v5930_v21  ;;  %5008 = vmatmul.mubr.msk.bf16.vlgmr.msra.gmra.mrb[52].mxu1 %vm660_vm3, %v5930_v21 }
 0xa5d   : > { %4972 = vmatpush3.bf16.msra.mxu0 %v5245_v36  ;;  %5020 = vmatpush3.bf16.msra.mxu1 %v5246_v37 }
 0xa5e   : > { %4973 = vmatprep.subr.bf16.mxu0 %v5378_v2  ;;  %5021 = vmatprep.subr.bf16.mxu1 %v5378_v2 }
 0xa5f   : > { %4975 = vmatprep.mubr.msk.bf16.mxu0 %vm5379_vm0, %v5378_v2  ;;  %5023 = vmatprep.mubr.msk.bf16.mxu1 %vm5379_vm0, %v5378_v2 }
 0xa61   : > { %4974 = vmatpush3.bf16.msra.mxu0 %v5247_v38  ;;  %5022 = vmatpush3.bf16.msra.mxu1 %v5248_v39 }
 0xa62   : > { %4979 = vmatprep.subr.bf16.mxu0 %v5378_v2  ;;  %5035 = vmatprep.subr.bf16.mxu1 %v5378_v2 }
 0xa64   : > { %4976 = vmatmul.mubr.msk.bf16.vlgmr.msra.gmra.mrb[52].mxu0 %vm660_vm3, %v5930_v21  ;;  %5024 = vmatmul.mubr.msk.bf16.vlgmr.msra.gmra.mrb[56].mxu1 %vm660_vm3, %v5930_v21 }
 0xa65   : > { %4980 = vmatpush3.bf16.msra.mxu0 %v5249_v40  ;;  %5036 = vmatpush3.bf16.msra.mxu1 %v5250_v41  ;;  %v4489_v40 = vld [vmem:[%s6311_s4 + $0x11] ss:$0 sm:$0xff] }
 0xa66   : > { %4981 = vmatprep.subr.bf16.mxu0 %v5378_v2  ;;  %5037 = vmatprep.subr.bf16.mxu1 %v5378_v2 }
 0xa67   : > { %4983 = vmatprep.mubr.msk.bf16.mxu0 %vm5379_vm0, %v5378_v2  ;;  %5039 = vmatprep.mubr.msk.bf16.mxu1 %vm5379_vm0, %v5378_v2 }
 0xa69   : > { %4982 = vmatpush3.bf16.msra.mxu0 %v5251_v42  ;;  %5038 = vmatpush3.bf16.msra.mxu1 %v5252_v45  ;;  %v4485_v42 = vld [vmem:[%s6311_s4 + $0xd] ss:$0 sm:$0xff] }
 0xa6a   : > { %4995 = vmatprep.subr.bf16.mxu0 %v5378_v2  ;;  %5051 = vmatprep.subr.mxu1 %v5378_v2 }
 0xa6c   : > { %4984 = vmatmul.mubr.msk.bf16.vlgmr.msra.gmra.mrb[56].mxu0 %vm660_vm3, %v5930_v21  ;;  %5040 = vmatmul.mubr.msk.bf16.vlgmr.msra.gmra.mrb[60].mxu1 %vm660_vm3, %v5930_v21 }
 0xa6d   : > { %4996 = vmatpush3.bf16.msra.mxu0 %v5253_v46  ;;  %4999 = vmatprep.mubr.msk.bf16.mxu0 %vm5379_vm0, %v5378_v2 }
 0xa6e   : > { %4997 = vmatprep.subr.bf16.mxu0 %v5378_v2  ;;  %5053 = vmatprep.mubr.msk.f32.mxu1 %vm5379_vm0, %v5378_v2 }
 0xa71   : > { %4998 = vmatpush3.bf16.msra.mxu0 %v5254_v47 }
 0xa72   : > { %5011 = vmatprep.subr.bf16.mxu0 %v5378_v2 }
 0xa74   : > { %5000 = vmatmul.mubr.msk.bf16.vlgmr.msra.gmra.mrb[60].mxu0 %vm660_vm3, %v5930_v21 }
 0xa75   : > { %5012 = vmatpush3.bf16.msra.mxu0 %v5255_v48  ;;  %5015 = vmatprep.mubr.msk.bf16.mxu0 %vm5379_vm0, %v5378_v2 }
 0xa76   : > { %5013 = vmatprep.subr.bf16.mxu0 %v5378_v2 }
 0xa79   : > { %5014 = vmatpush3.bf16.msra.mxu0 %v5256_v49 }
 0xa7a   : > { %5027 = vmatprep.subr.bf16.mxu0 %v5378_v2 }
 0xa7c   : > { %5016 = vmatmul.mubr.msk.bf16.vlgmr.msra.gmra.mrb[64].mxu0 %vm660_vm3, %v5930_v21 }
 0xa7d   : > { %5028 = vmatpush3.bf16.msra.mxu0 %v5257_v50  ;;  %5031 = vmatprep.mubr.msk.bf16.mxu0 %vm5379_vm0, %v5378_v2  ;;  %v4491_v50 = vld [vmem:[%s6311_s4 + $0x13] ss:$0 sm:$0xff] }
 0xa7e   : > { %5029 = vmatprep.subr.bf16.mxu0 %v5378_v2 }
 0xa81   : > { %5030 = vmatpush3.bf16.msra.mxu0 %v5258_v51 }
 0xa82   : > { %5043 = vmatprep.subr.bf16.mxu0 %v5378_v2 }
 0xa84   : > { %5032 = vmatmul.mubr.msk.bf16.vlgmr.msra.gmra.mrb[68].mxu0 %vm660_vm3, %v5930_v21 }
 0xa85   : > { %5044 = vmatpush3.bf16.msra.mxu0 %v5259_v52  ;;  %5047 = vmatprep.mubr.msk.bf16.mxu0 %vm5379_vm0, %v5378_v2  ;;  %v4487_v52 = vld [vmem:[%s6311_s4 + $0xf] ss:$0 sm:$0xff] }
 0xa86   : > { %5045 = vmatprep.subr.bf16.mxu0 %v5378_v2 }
 0xa89   : > { %5046 = vmatpush3.bf16.msra.mxu0 %v5260_v53 }
 0xa8a   : > { %5061 = vmatprep.subr.mxu0 %v5378_v2 }
 0xa8c   : > { %5048 = vmatmul.mubr.msk.bf16.vlgmr.msra.gmra.mrb[72].mxu0 %vm660_vm3, %v5930_v21 }
 0xa8d   : > { %5063 = vmatprep.mubr.msk.f32.mxu0 %vm5379_vm0, %v5378_v2 }
 0xb27   : > { %v2531_v56 = vpop.f32.mrb[44].mxu0  ;;  %v2739_v57 = vpop.f32.mrb[48].mxu1 }
 0xb28   : > { %v2740_v59 = vadd.f32 %v4488_v55, %v2739_v57  ;;  %v4961_v60 = vpop.f32.mrb[45].mxu0  ;;  %v4993_v61 = vpop.f32.mrb[49].mxu1  ;;  %v2532_v5 = vadd.f32 %v4484_v58, %v2531_v56 }
 0xb29   : > { %v2534_v62 = vpop.f32.mrb[46].mxu0  ;;  %v2742_v1 = vpop.f32.mrb[50].mxu1 }
 0xb2a   : > { %v4962_v3 = vpop.f32.mrb[47].mxu0  ;;  %v4994_v4 = vpop.f32.mrb[51].mxu1  ;;  %5052 = vmatpush3.xpose.msk.msra.mxu1 %vm1276_vm4, %v2740_v59  ;;  %v4493_v59 = vld [vmem:[%s6311_s4 + $0x15] ss:$0 sm:$0xff] }
 0xb2b   : > { %5056 = vmatprep.subr.mxu1 %v5378_v2 }
 0xb2d   : > { %5054 = vmatmul.mubr.msk.f32.vlgmr.msra.gmra.mrb[64].mxu1 %vm1276_vm4, %v2532_v5 }
 0xb2e   : > { %5058 = vmatprep.mubr.msk.f32.mxu1 %vm5379_vm0, %v5378_v2 }
 0xb2f   : > { %v2583_v7 = vpop.f32.mrb[48].mxu0  ;;  %v2843_v8 = vpop.f32.mrb[52].mxu1 }
 0xb30   : > { %v2844_v9 = vadd.f32 %v4490_v6, %v2843_v8  ;;  %v4969_v11 = vpop.f32.mrb[49].mxu0  ;;  %v5009_v13 = vpop.f32.mrb[53].mxu1  ;;  %v2584_v49 = vadd.f32 %v4485_v42, %v2583_v7 }
 0xb31   : > { %v2586_v14 = vpop.f32.mrb[50].mxu0  ;;  %v2846_v15 = vpop.f32.mrb[54].mxu1 }
 0xb32   : > { %v4970_v16 = vpop.f32.mrb[51].mxu0  ;;  %v5010_v17 = vpop.f32.mrb[55].mxu1  ;;  %5062 = vmatpush3.xpose.msk.msra.mxu0 %vm1276_vm4, %v2844_v9 }
 0xb33   : > { %5071 = vmatprep.subr.mxu0 %v5378_v2 }
 0xb37   : > { %v2635_v20 = vpop.f32.mrb[52].mxu0  ;;  %v2947_v22 = vpop.f32.mrb[56].mxu1 }
 0xb38   : > { %v2636_v23 = vadd.f32 %v4486_v18, %v2635_v20  ;;  %v2948_v24 = vadd.f32 %v4492_v19, %v2947_v22  ;;  %v4977_v27 = vpop.f32.mrb[53].mxu0  ;;  %v5025_v28 = vpop.f32.mrb[57].mxu1 }
 0xb39   : > { %v2638_v29 = vpop.f32.mrb[54].mxu0  ;;  %v2950_v30 = vpop.f32.mrb[58].mxu1 }
 0xb3a   : > { %v4978_v31 = vpop.f32.mrb[55].mxu0  ;;  %v5026_v34 = vpop.f32.mrb[59].mxu1  ;;  %5064 = vmatmul.mubr.msk.f32.vlgmr.msra.gmra.mrb[76].mxu0 %vm1276_vm4, %v2636_v23 }
 0xb3b   : > { %5072 = vmatpush3.msra.mxu0 %v2948_v24  ;;  %5073 = vmatprep.mubr.msk.f32.mxu0 %vm5379_vm0, %v5378_v2 }
 0xb3c   : > { %5081 = vmatprep.subr.mxu0 %v5378_v2 }
 0xb3f   : > { %v2687_v33 = vpop.f32.mrb[56].mxu0  ;;  %v6080_v21 = vpop.f32.mrb[60].mxu1 }
 0xb40   : > { %v4985_v12 = vpop.f32.mrb[57].mxu0  ;;  %v5041_v35 = vpop.f32.mrb[61].mxu1  ;;  %v2688_v58 = vadd.f32 %v4487_v52, %v2687_v33 }
 0xb41   : > { %v2690_v36 = vpop.f32.mrb[58].mxu0  ;;  %v3054_v37 = vpop.f32.mrb[62].mxu1 }
 0xb42   : > { %v4986_v38 = vpop.f32.mrb[59].mxu0  ;;  %v5042_v39 = vpop.f32.mrb[63].mxu1 }
 0xb47   : > { %v2791_v41 = vpop.f32.mrb[60].mxu0 }
 0xb48   : > { %v2792_v45 = vadd.f32 %v4489_v40, %v2791_v41  ;;  %v5001_v46 = vpop.f32.mrb[61].mxu0 }
 0xb49   : > { %v2794_v47 = vpop.f32.mrb[62].mxu0 }
 0xb4a   : > { %v5002_v48 = vpop.f32.mrb[63].mxu0  ;;  %5057 = vmatpush3.xpose.msk.msra.mxu1 %vm1276_vm4, %v2792_v45 }
 0xb4b   : > { %5066 = vmatprep.subr.mxu1 %v5378_v2  ;;  %v4494_v48 = vld [vmem:[%s6311_s4 + $0x16] ss:$0 sm:$0xff] }
 0xb4d   : > { %5059 = vmatmul.mubr.msk.f32.vlgmr.msra.gmra.mrb[66].mxu1 %vm1276_vm4, %v2584_v49 }
 0xb4e   : > { %5068 = vmatprep.mubr.msk.f32.mxu1 %vm5379_vm0, %v5378_v2 }
 0xb4f   : > { %v2895_v51 = vpop.f32.mrb[64].mxu0 }
 0xb50   : > { %v2896_v53 = vadd.f32 %v4491_v50, %v2895_v51  ;;  %v5017_v55 = vpop.f32.mrb[65].mxu0  ;;  %v3052_v51 = vadd.f32 %v4494_v48, %v6080_v21 }
 0xb51   : > { %v2898_v56 = vpop.f32.mrb[66].mxu0 }
 0xb52   : > { %v5018_v57 = vpop.f32.mrb[67].mxu0  ;;  %5067 = vmatpush3.xpose.msk.msra.mxu1 %vm1276_vm4, %v2896_v53 }
 0xb53   : > { %5076 = vmatprep.subr.mxu1 %v5378_v2  ;;  %v4495_v57 = vld [vmem:[%s6311_s4 + $0x17] ss:$0 sm:$0xff] }
 0xb55   : > { %5069 = vmatmul.mubr.msk.f32.vlgmr.msra.gmra.mrb[68].mxu1 %vm1276_vm4, %v2688_v58 }
 0xb56   : > { %5078 = vmatprep.mubr.msk.f32.mxu1 %vm5379_vm0, %v5378_v2 }
 0xb57   : > { %v2999_v60 = vpop.f32.mrb[68].mxu0 }
 0xb58   : > { %v3000_v61 = vadd.f32 %v4493_v59, %v2999_v60  ;;  %v5033_v62 = vpop.f32.mrb[69].mxu0 }
 0xb59   : > { %v3002_v1 = vpop.f32.mrb[70].mxu0 }
 0xb5a   : > { %v5034_v3 = vpop.f32.mrb[71].mxu0  ;;  %5077 = vmatpush3.msra.mxu1 %v3000_v61  ;;  %v4544_v1 = vld [vmem:[%s6312_s5 + $0x10] sm:$0xf] }
 0xb5b   : > { %5086 = vmatprep.subr.mxu1 %v5378_v2  ;;  %v3762_v3 = vsel %vm1928_vm5, %v4544_v1, 0  ;;  %v5264_v1 = vld [vmem:[%s6314_s7 + $0x48] sm:$0xff]  }
 0xb5f   : > { %v6108_v4 = vpop.f32.mrb[72].mxu0 }
 0xb60   : > { %v5049_v5 = vpop.f32.mrb[73].mxu0  ;;  %v3104_v60 = vadd.f32 %v4495_v57, %v6108_v4  ;;  %v4545_v4 = vld [vmem:[%s6312_s5 + $0x14] sm:$0xf] }
 0xb61   : > { %v3106_v6 = vpop.f32.mrb[74].mxu0  ;;  %v3808_v5 = vsel %vm1928_vm5, %v4545_v4, 0  ;;  %v5266_v4 = vld [vmem:[%s6314_s7 + $0x58] sm:$0xff]  }
 0xb62   : > { %v5050_v7 = vpop.f32.mrb[75].mxu0  ;;  %v4546_v6 = vld [vmem:[%s6312_s5 + $0x18] sm:$0xf] }
 0xc00   : > { %v3181_v8 = vpop.f32.mrb[64].mxu1 }
 0xc01   : > { %v5055_v9 = vpop.f32.mrb[65].mxu1  ;;  %v3413_v11 = vsel %vm1276_vm4, %v3181_v8, -inf }
 0xc02   : > { %3414 = vmax.xlane.f32.xlu0 %v3413_v11  ;;  %v3854_v11 = vsel %vm1928_vm5, %v4546_v6, 0  ;;  %v5268_v6 = vld [vmem:[%s6314_s7 + $0x68] sm:$0xff]  }
 0xc0d   : > { %v3333_v13 = vpop.f32.mrb[76].mxu0 }
 0xc0e   : > { %v5065_v14 = vpop.f32.mrb[77].mxu0  ;;  %v3419_v15 = vsel %vm1276_vm4, %v3333_v13, -inf }
 0xc0f   : > { %3420 = vmax.xlane.f32.xlu0 %v3419_v15 }
 0xc20   : > { %v3257_v16 = vpop.f32.mrb[66].mxu1 }
 0xc21   : > { %v5060_v17 = vpop.f32.mrb[67].mxu1  ;;  %v3416_v18 = vsel %vm1276_vm4, %v3257_v16, -inf }
 0xc22   : > { %3417 = vmax.xlane.f32.xlu1 %v3416_v18 }
 0xc28   : > { %v3409_v19 = vpop.f32.mrb[68].mxu1 }
 0xc29   : > { %v5070_v20 = vpop.f32.mrb[69].mxu1  ;;  %v3422_v22 = vsel %vm1276_vm4, %v3409_v19, -inf }
 0xc2a   : > { %3423 = vmax.xlane.f32.xlu1 %v3422_v22 }
 0xc8f   : > { %v3415_v23 = vpop.xlane.xlu0 %3414 }
 0xc90   : > { %v3425_v24 = vsub.f32 %v3181_v8, %v3415_v23 }
 0xc92   : > { %v3429_v27 = vmul.f32 1.442695, %v3425_v24 }
 0xc94   : > { %5293 = vpow2.f32 %v3429_v27 }
 0xc9c   : > { %v3421_v28 = vpop.xlane.xlu0 %3420 }
 0xc9d   : > { %v3427_v29 = vsub.f32 %v3333_v13, %v3421_v28 }
 0xc9e   : > { %v5294_v30 = vpop.eup %5293 }
 0xc9f   : > { %v3433_v31 = vmul.f32 1.442695, %v3427_v29  ;;  %v3437_v34 = vsel %vm1276_vm4, %v5294_v30, 0.0 }
 0xca0   : > { %3438 = vadd.xlane.f32.xlu0 %v3437_v34 }
 0xca1   : > { %5295 = vpow2.f32 %v3433_v31 }
 0xcab   : > { %v5296_v33 = vpop.eup %5295 }
 0xcac   : > { %v3443_v12 = vsel %vm1276_vm4, %v5296_v33, 0.0 }
 0xcad   : > { %3444 = vadd.xlane.f32.xlu0 %v3443_v12 }
 0xcaf   : > { %v3418_v35 = vpop.xlane.xlu1 %3417 }
 0xcb0   : > { %v3426_v36 = vsub.f32 %v3257_v16, %v3418_v35  ;;  %v4547_v16 = vld [vmem:[%s6312_s5 + $0x1c] sm:$0xf] }
 0xcb1   : > { %v3900_v20 = vsel %vm1928_vm5, %v4547_v16, 0 }
 0xcb2   : > { %v3431_v37 = vmul.f32 1.442695, %v3426_v36 }
 0xcb4   : > { %5297 = vpow2.f32 %v3431_v37 }
 0xcb7   : > { %v3424_v38 = vpop.xlane.xlu1 %3423 }
 0xcb8   : > { %v3428_v39 = vsub.f32 %v3409_v19, %v3424_v38 }
 0xcba   : > { %v3435_v40 = vmul.f32 1.442695, %v3428_v39 }
 0xcbc   : > { %5299 = vpow2.f32 %v3435_v40 }
 0xcbe   : > { %v5298_v41 = vpop.eup %5297 }
 0xcbf   : > { %v3440_v42 = vsel %vm1276_vm4, %v5298_v41, 0.0 }
 0xcc0   : > { %3441 = vadd.xlane.f32.xlu1 %v3440_v42 }
 0xcc6   : > { %v5300_v45 = vpop.eup %5299 }
 0xcc7   : > { %v3446_v46 = vsel %vm1276_vm4, %v5300_v45, 0.0 }
 0xcc8   : > { %3447 = vadd.xlane.f32.xlu1 %v3446_v46  ;;  %v6178_v46 = vld [vmem:[%s6315_s8 + $0x8] sm:$0xff] }
 0xcc9   : > { %v3952_v48 = vrot.slane %v6178_v46, %v2119_v10  ;;  %v5261_v10 = vld [vmem:[%s6313_s6 + $0x10] sm:$0xff]  }
 0xd2d   : > { %v3439_v47 = vpop.xlane.xlu0 %3438 }
 0xd2e   : > { %5301 = vrcp.f32 %v3439_v47 }
 0xd38   : > { %v5302_v49 = vpop.eup %5301 }
 0xd39   : > { %v3453_v50 = vmul.f32 %v5302_v49, %v5294_v30 }
 0xd3a   : > { %v3445_v52 = vpop.xlane.xlu0 %3444 }
 0xd3b   : > { %5303 = vrcp.f32 %v3445_v52  ;;  %5074 = vmatmul.mubr.msk.f32.vlgmr.msra.gmra.mrb[78].mxu0 %vm1276_vm4, %v3453_v50 }
 0xd3c   : > { %5082 = vmatpush3.msra.mxu0 %v3052_v51  ;;  %5083 = vmatprep.mubr.msk.f32.mxu0 %vm5379_vm0, %v5378_v2 }
 0xd3d   : > { %5091 = vmatprep.subr.bf16.mxu0 %v5378_v2 }
 0xd45   : > { %v5304_v53 = vpop.eup %5303 }
 0xd46   : > { %v3455_v55 = vmul.f32 %v5304_v53, %v5296_v33 }
 0xd48   : > { %5084 = vmatmul.mubr.msk.f32.vlgmr.msra.gmra.mrb[80].mxu0 %vm1276_vm4, %v3455_v55 }
 0xd49   : > { %5093 = vmatprep.mubr.msk.bf16.mxu0 %vm5379_vm0, %v5378_v2  ;;  %5092 = vmatpush3.bf16.msra.mxu0 %v3762_v3  ;;  %v5265_v3 = vld [vmem:[%s6314_s7 + $0x50] sm:$0xff]  }
 0xd4a   : > { %5103 = vmatprep.subr.bf16.mxu0 %v5378_v2 }
 0xd4d   : > { %v3442_v56 = vpop.xlane.xlu1 %3441 }
 0xd4e   : > { %5305 = vrcp.f32 %v3442_v56 }
 0xd55   : > { %v3448_v21 = vpop.xlane.xlu1 %3447 }
 0xd56   : > { %5307 = vrcp.f32 %v3448_v21 }
 0xd58   : > { %v5306_v58 = vpop.eup %5305 }
 0xd59   : > { %v3454_v59 = vmul.f32 %v5306_v58, %v5298_v41 }
 0xd5b   : > { %5079 = vmatmul.mubr.msk.f32.vlgmr.msra.gmra.mrb[70].mxu1 %vm1276_vm4, %v3454_v59 }
 0xd5c   : > { %5087 = vmatpush3.msra.mxu1 %v3104_v60  ;;  %5088 = vmatprep.mubr.msk.f32.mxu1 %vm5379_vm0, %v5378_v2 }
 0xd5d   : > { %5097 = vmatprep.subr.bf16.mxu1 %v5378_v2 }
 0xd60   : > { %v5308_v61 = vpop.eup %5307 }
 0xd61   : > { %v3456_v62 = vmul.f32 %v5308_v61, %v5300_v45 }
 0xd63   : > { %5089 = vmatmul.mubr.msk.f32.vlgmr.msra.gmra.mrb[72].mxu1 %vm1276_vm4, %v3456_v62  ;;  %v5262_v62 = vld [vmem:[%s6313_s6 + $0x18] sm:$0xff]  }
 0xd64   : > { %5099 = vmatprep.mubr.msk.bf16.mxu1 %vm5379_vm0, %v5378_v2  ;;  %5098 = vmatpush3.bf16.msra.mxu1 %v3808_v5  ;;  %v5267_v5 = vld [vmem:[%s6314_s7 + $0x60] sm:$0xff]  }
 0xd65   : > { %5109 = vmatprep.subr.bf16.mxu1 %v5378_v2 }
 0xe0e   : > { %v3526_v7 = vpop.f32.mrb[78].mxu0 }
 0xe0f   : > { %v3749_v8 = vpack.c.bf16 %v3526_v7, %v3526_v7  ;;  %v5075_v9 = vpop.f32.mrb[79].mxu0 }
 0xe11   : > { %5094 = vmatmul.mubr.msk.bf16.vlgmr.msra.gmra.mrb[84].mxu0 %vm1276_vm4, %v3749_v8 }
 0xe12   : > { %5104 = vmatpush3.bf16.msra.mxu0 %v3854_v11  ;;  %5105 = vmatprep.mubr.msk.bf16.mxu0 %vm5379_vm0, %v5378_v2  ;;  %v3971_v11 = vrot.slane %v6178_v46, %v2139_v43  ;;  %v5270_v43 = vld [vmem:[%s6314_s7 + $0x78] sm:$0xff]  }
 0xe13   : > { %5115 = vmatprep.subr.bf16.mxu0 %v5378_v2 }
 0xe1b   : > { %v3672_v13 = vpop.f32.mrb[80].mxu0 }
 0xe1c   : > { %v3751_v14 = vpack.c.bf16 %v3672_v13, %v3672_v13  ;;  %v5085_v15 = vpop.f32.mrb[81].mxu0 }
 0xe1d   : > { %v3976_v15 = vrot.slane %v6178_v46, %v2144_v44  ;;  %v3987_v44 = vrot.slane %v6178_v46, %v2154_v54 }
 0xe1e   : > { %5106 = vmatmul.mubr.msk.bf16.vlgmr.msra.gmra.mrb[88].mxu0 %vm1276_vm4, %v3751_v14 }
 0xe1f   : > { %5119 = vmatprep.mubr.msk.bf16.mxu0 %vm5379_vm0, %v5378_v2  ;;  %5116 = vmatpush3.bf16.msra.mxu0 %v5261_v10 }
 0xe20   : > { %5117 = vmatprep.subr.bf16.mxu0 %v5378_v2 }
 0xe23   : > { %5118 = vmatpush3.bf16.msra.mxu0 %v5262_v62 }
 0xe24   : > { %5143 = vmatprep.subr.bf16.mxu0 %v5378_v2 }
 0xe2e   : > { %v3599_v17 = vpop.f32.mrb[70].mxu1 }
 0xe2f   : > { %v3750_v18 = vpack.c.bf16 %v3599_v17, %v3599_v17  ;;  %v5080_v19 = vpop.f32.mrb[71].mxu1 }
 0xe30   : > { %v5269_v19 = vld [vmem:[%s6314_s7 + $0x70] sm:$0xff]  }
 0xe31   : > { %5100 = vmatmul.mubr.msk.bf16.vlgmr.msra.gmra.mrb[76].mxu1 %vm1276_vm4, %v3750_v18 }
 0xe32   : > { %5110 = vmatpush3.bf16.msra.mxu1 %v3900_v20  ;;  %5111 = vmatprep.mubr.msk.bf16.mxu1 %vm5379_vm0, %v5378_v2 }
 0xe33   : > { %5123 = vmatprep.subr.bf16.mxu1 %v5378_v2 }
 0xe36   : > { %v3745_v22 = vpop.f32.mrb[72].mxu1 }
 0xe37   : > { %v3752_v23 = vpack.c.bf16 %v3745_v22, %v3745_v22  ;;  %v5090_v24 = vpop.f32.mrb[73].mxu1 }
 0xe39   : > { %5112 = vmatmul.mubr.msk.bf16.vlgmr.msra.gmra.mrb[80].mxu1 %vm1276_vm4, %v3752_v23 }
 0xe3a   : > { %5139 = vmatprep.mubr.msk.bf16.mxu1 %vm5379_vm0, %v5378_v2 }
 0xee4   : > { %v3798_v27 = vpop.f32.mrb[84].mxu0 }
 0xee5   : > { %v5095_v28 = vpop.f32.mrb[85].mxu0  ;;  %v3942_v36 = vsel %vm660_vm3, %v3798_v27, 0.0 }
 0xee6   : > { %v3801_v29 = vpop.f32.mrb[86].mxu0 }
 0xee7   : > { %v5096_v30 = vpop.f32.mrb[87].mxu0 }
 0xee8   : > { %v4065_v30 = vrot.slane %v6178_v46, %v2231_v63  ;;  %v5271_v63 = vld [vmem:[%s6316_s9] sm:$0xff]  }
 0xef1   : > { %v3890_v31 = vpop.f32.mrb[88].mxu0 }
 0xef2   : > { %v5107_v34 = vpop.f32.mrb[89].mxu0  ;;  %v3945_v41 = vsel %vm660_vm3, %v3890_v31, 0.0 }
 0xef3   : > { %v3893_v33 = vpop.f32.mrb[90].mxu0 }
 0xef4   : > { %v5108_v12 = vpop.f32.mrb[91].mxu0 }
 0xf04   : > { %v3844_v35 = vpop.f32.mrb[76].mxu1 }
 0xf05   : > { %v3943_v37 = vsel %vm660_vm3, %v3844_v35, 0.0  ;;  %v5101_v38 = vpop.f32.mrb[77].mxu1 }
 0xf06   : > { %v3944_v39 = vadd.f32 %v3943_v37, %v3942_v36  ;;  %v3847_v40 = vpop.f32.mrb[78].mxu1 }
 0xf07   : > { %v5102_v42 = vpop.f32.mrb[79].mxu1 }
 0xf08   : > { %v3946_v45 = vadd.f32 %v3945_v41, %v3944_v39  ;;  %v5272_v42 = vld [vmem:[%s6316_s9 + $0x8] sm:$0xff]  }
 0xf0c   : > { %v3936_v47 = vpop.f32.mrb[80].mxu1 }
 0xf0d   : > { %v3947_v49 = vsel %vm660_vm3, %v3936_v47, 0.0  ;;  %v5113_v50 = vpop.f32.mrb[81].mxu1 }
 0xf0e   : > { %v3948_v51 = vadd.f32 %v3947_v49, %v3946_v45  ;;  %v3939_v52 = vpop.f32.mrb[82].mxu1  ;;  %v4171_v49 = vrot.slane %v6178_v46, %v2337_v25 }
 0xf0f   : > { %v5114_v53 = vpop.f32.mrb[83].mxu1  ;;  %v4176_v52 = vrot.slane %v6178_v46, %v2342_v26 }
 0xf10   : > { %v3953_v55 = vadd.f32 %v3952_v48, %v3948_v51 }
 0xf12   : > { %v3954_v56 = vadd.f32 %v3953_v55, %v5920_v32  ;;  %v5263_v32 = vld [vmem:[%s6314_s7 + $0x40] sm:$0xff]  }
 0xf13   : > { %5124 = vmatpush3.bf16.msra.mxu1 %v5263_v32 }
 0xf14   : > { %v3955_v21 = vsel %vm660_vm3, %v3954_v56, 0.0  ;;  %5125 = vmatprep.subr.bf16.mxu1 %v5378_v2 }
 0xf15   : > { %3956 = vadd.xlane.f32.xlu0 %v3955_v21 }
 0xf17   : > { %5126 = vmatpush3.bf16.msra.mxu1 %v5264_v1 }
 0xf18   : > { %5127 = vmatprep.subr.bf16.mxu1 %v5378_v2 }
 0xf1b   : > { %5128 = vmatpush3.bf16.msra.mxu1 %v5265_v3 }
 0xf1c   : > { %5129 = vmatprep.subr.bf16.mxu1 %v5378_v2 }
 0xf1f   : > { %5130 = vmatpush3.bf16.msra.mxu1 %v5266_v4 }
 0xf20   : > { %5131 = vmatprep.subr.bf16.mxu1 %v5378_v2 }
 0xf23   : > { %5132 = vmatpush3.bf16.msra.mxu1 %v5267_v5 }
 0xf24   : > { %5133 = vmatprep.subr.bf16.mxu1 %v5378_v2 }
 0xf27   : > { %5134 = vmatpush3.bf16.msra.mxu1 %v5268_v6 }
 0xf28   : > { %5135 = vmatprep.subr.bf16.mxu1 %v5378_v2 }
 0xf2b   : > { %5136 = vmatpush3.bf16.msra.mxu1 %v5269_v19 }
 0xf2c   : > { %5137 = vmatprep.subr.bf16.mxu1 %v5378_v2 }
 0xf2f   : > { %5138 = vmatpush3.bf16.msra.mxu1 %v5270_v43 }
 0xfa2   : > { %v3957_v57 = vpop.xlane.xlu0 %3956 }
 0xfa3   : > { %v3958_v58 = vmul.f32 0.03125, %v3957_v57 }
 0xfa5   : > { %v3959_v59 = vsub.f32 %v3954_v56, %v3958_v58 }
 0xfa7   : > { %v3960_v60 = vmul.f32 %v3959_v59, %v3959_v59 }
 0xfa9   : > { %v3961_v61 = vsel %vm660_vm3, %v3960_v60, 0.0 }
 0xfaa   : > { %3962 = vadd.xlane.f32.xlu1 %v3961_v61 }
0x1037   : > { %v3963_v7 = vpop.xlane.xlu1 %3962 }
0x1038   : > { %v3964_v8 = vmul.f32 0.03125, %v3963_v7 }
0x103a   : > { %v3965_v9 = vadd.f32 1e-05, %v3964_v8 }
0x103c   : > { %5309 = vrsqrt.f32 %v3965_v9 }
0x1046   : > { %v5310_v13 = vpop.eup %5309 }
0x1047   : > { %v3967_v14 = vmul.f32 %v5310_v13, %v3959_v59 }
0x1049   : > { %v3972_v16 = vmul.f32 %v3971_v11, %v3967_v14 }
0x104b   : > { %v3977_v17 = vadd.f32 %v3976_v15, %v3972_v16 }
0x104d   : > { %v3978_v18 = vpack.c.bf16 %v3977_v17, %v3977_v17 }
0x104f   : > { %5120 = vmatmul.mubr.msk.bf16.vlgmr.msra.gmra.mrb[92].mxu0 %vm660_vm3, %v3978_v18 }
0x1050   : > { %5147 = vmatprep.mubr.msk.bf16.mxu0 %vm5379_vm0, %v5378_v2  ;;  %5144 = vmatpush3.bf16.msra.mxu0 %v5271_v63 }
0x1051   : > { %5145 = vmatprep.subr.bf16.mxu0 %v5378_v2  ;;  %v4583_v2 = vld [vmem:[%s6317_s10] ss:$0 sm:$0xff] }
0x1054   : > { %5146 = vmatpush3.bf16.msra.mxu0 %v5272_v42 }
0x1122   : > { %v4037_v20 = vpop.f32.mrb[92].mxu0 }
0x1123   : > { %v4038_v22 = vadd.f32 %v4037_v20, %v3987_v44  ;;  %v5121_v23 = vpop.f32.mrb[93].mxu0 }
0x1124   : > { %v4040_v24 = vpop.f32.mrb[94].mxu0 }
0x1125   : > { %v4043_v27 = vmax.f32 %v4038_v22, 0.0  ;;  %v5122_v28 = vpop.f32.mrb[95].mxu0 }
0x1127   : > { %v4044_v29 = vpack.c.bf16 %v4043_v27, %v4043_v27 }
0x1129   : > { %5140 = vmatmul.mubr.bf16.vlgmr.msra.gmra.mrb[84].mxu1 %v4044_v29 }
0x11fc   : > { %v4148_v31 = vpop.f32.mrb[84].mxu1 }
0x11fd   : > { %v4149_v34 = vadd.f32 %v4148_v31, %v4065_v30  ;;  %v5141_v33 = vpop.f32.mrb[85].mxu1 }
0x11fe   : > { %v4151_v12 = vpop.f32.mrb[86].mxu1 }
0x11ff   : > { %v5142_v35 = vpop.f32.mrb[87].mxu1  ;;  %v4154_v36 = vadd.f32 %v4149_v34, %v3977_v17 }
0x1201   : > { %v4155_v54 = vsel %vm660_vm3, %v4154_v36, 0.0 }
0x1202   : > { %4156 = vadd.xlane.f32.xlu0 %v4155_v54 }
0x128f   : > { %v4157_v37 = vpop.xlane.xlu0 %4156 }
0x1290   : > { %v4158_v38 = vmul.f32 0.03125, %v4157_v37 }
0x1292   : > { %v4159_v39 = vsub.f32 %v4154_v36, %v4158_v38 }
0x1294   : > { %v4160_v40 = vmul.f32 %v4159_v39, %v4159_v39 }
0x1296   : > { %v4161_v41 = vsel %vm660_vm3, %v4160_v40, 0.0 }
0x1297   : > { %4162 = vadd.xlane.f32.xlu1 %v4161_v41 }
0x1324   : > { %v4163_v45 = vpop.xlane.xlu1 %4162 }
0x1325   : > { %v4164_v47 = vmul.f32 0.03125, %v4163_v45 }
0x1327   : > { %v4165_v48 = vadd.f32 1e-05, %v4164_v47 }
0x1329   : > { %5311 = vrsqrt.f32 %v4165_v48 }
0x1333   : > { %v5312_v50 = vpop.eup %5311 }
0x1334   : > { %v4167_v51 = vmul.f32 %v5312_v50, %v4159_v39 }
0x1336   : > { %v4172_v53 = vmul.f32 %v4171_v49, %v4167_v51 }
0x1338   : > { %v4177_v55 = vadd.f32 %v4176_v52, %v4172_v53 }
0x133a   : > { %v4178_v56 = vpack.c.bf16 %v4177_v55, %v4177_v55 }
0x133c   : > { %5148 = vmatmul.mubr.msk.bf16.vlgmr.msra.gmra.mrb[96].mxu0 %vm660_vm3, %v4178_v56 }
0x140f   : > { %v4239_v25 = vpop.f32.mrb[96].mxu0 }
0x1410   : > { %v4240_v21 = vadd.f32 %v4583_v2, %v4239_v25  ;;  %v5149_v0 = vpop.f32.mrb[97].mxu0 }
0x1411   : > { %v4242_v26 = vpop.f32.mrb[98].mxu0 }
0x1412   : > { %4245 = vst [vmem:[%s390_s15] sm:$0xff] %v4240_v21  ;;  %v5150_v46 = vpop.f32.mrb[99].mxu0 }
0x1413   : > { %5326 = shalt.err (!%p5323_p3)
}
0x1414   : > { %s5327_s24 = scalar_lea.hbm %s6265_s22, 128  ;;  %s5331_s16 = scalar_lea.hbm %s6318_s11, 256 }
0x1415   : > { %p5328_p4 = scmp.ne.s32.totalorder %s6265_s22, %s5327_s24  ;;  %p5332_p9 = scmp.lt.u32.totalorder %s6265_s22, %s6318_s11 }
0x1416   : > { %p5333_p10 = scmp.lt.u32.totalorder %s5331_s16, %s5327_s24  ;;  %p5335_p12 = scmp.lt.u32.totalorder %s5327_s24, %s6265_s22 }
0x1417   : > { %p5329_p7 = pnand %p5328_p4, %p5480_p5 }
0x1418   : > { %p5334_p11 = por %p5333_p10, %p5332_p9 }
0x1419   : > { %p5330_p8 = pneg %p5329_p7 }
0x141a   : > { %p5336_p13 = por %p5335_p12, %p5334_p11 }
0x141c   : > { %p5337_p0 = pnand %p5336_p13, %p5330_p8 }
0x141e   : > { %5340 = shalt.err (!%p5337_p0)
}
0x141f   : > { %5151 = dma.vmem_to_hbm [thread:$0]  (%p5480_p5), %s6267_s13, 128, %s6265_s22, %s4247_s29  }
0x1420 PF: > { %p5157_p1 = scmp.ge.s32.totalorder %s5375_s20, 2  ;;  %s4272_s21 = sand.u32 1, %s5363_s17  }
0x1421   : > { %s4273_s14 = scalar_lea.sflag [#allocation3], %s4272_s21 }
0x1422   : > { %p5154_p2 = pnand %p5157_p1, %p5484_p6 }
0x1424   : > { %5358 = dma.done.wait (!%p5154_p2), %s4273_s14, 128  }
0x1425   : > { %5360 = vsyncadd (!%p5154_p2), %s4273_s14, 4294967168  ;;  %p21_p3 = scmp.ge.s32.totalorder %s5467_s23, 4   ;;  %s6321_s17 = smov %s5367_s18 }
0x1426   : > { %s6322_s18 = smov %s5371_s19  ;;  %s6323_s19 = smov %s5478_s26 }
0x1427   : > { %s6324_s20 = smov %s5467_s23  ;;  %23 = sbr.rel (!%p21_p3) target bundleno = 3 (0x3), region = 108 }
0x142e   :  { %4278 = vsyncpa [#allocation3], 1 }
0x142f   :  { %4280 = vsyncpa [#allocation3 + $0x1], 1 }

</bundles_post_ra>
